<compile_context>
chip_gen: v7x
topology: tpu7x:2x2x1
jax: 0.10.0
libtpu: 0.0.40
codegen_flags: <defaults>
</compile_context>

<pallas_src>
import functools
import math

import jax
import jax.numpy as jnp
from jax.experimental import pallas as pl
from jax.experimental.pallas import tpu as pltpu


# ----------------------------------------------------------------------- in-kernel helpers

def _erf(x):
    # Abramowitz & Stegun 7.1.26 rational approximation (|err| < 1.5e-7); only ops with
    # guaranteed Mosaic lowering.  Matches HF exact-erf GELU far below bf16 matmul noise.
    a1, a2, a3, a4, a5 = 0.254829592, -0.284496736, 1.421413741, -1.453152027, 1.061405429
    p = 0.3275911
    ax = jnp.abs(x)
    t = 1.0 / (1.0 + p * ax)
    poly = ((((a5 * t + a4) * t + a3) * t + a2) * t + a1) * t
    y = 1.0 - poly * jnp.exp(-ax * ax)
    return jnp.where(x >= 0, y, -y)


def _layernorm(y, g, b, eps=1e-12):
    mu = jnp.mean(y, axis=-1, keepdims=True)
    yc = y - mu
    var = jnp.mean(yc * yc, axis=-1, keepdims=True)
    return yc * jax.lax.rsqrt(var + eps) * g + b


# ----------------------------------------------------------------------------------- kernels

def _emb_ln_kernel(x_ref, g_ref, b_ref, o_ref):
    x = x_ref[...].astype(jnp.float32)
    o_ref[...] = _layernorm(x, g_ref[...], b_ref[...]).astype(o_ref.dtype)


def _encoder_layer_kernel(x_ref, bias_ref, wqkv_ref, bqkv_ref, wo_ref, bo_ref,
                          g1_ref, b1_ref, wi_ref, bi_ref, wo2_ref, bo2_ref,
                          g2_ref, b2_ref, o_ref, *, num_heads, scale):
    """One grid step == one batch element's full encoder layer (attention + FFN)."""
    x_bf = x_ref[...]                                   # (S, H) bf16
    x = x_bf.astype(jnp.float32)
    S, H = x.shape
    dh = H // num_heads
    bias = bias_ref[0].astype(jnp.float32)              # (1, S) additive attention mask

    # ---- fused QKV projection: one lane-dense (S,H)x(H,3H) MXU matmul ----
    qkv = jnp.dot(x_bf, wqkv_ref[...], preferred_element_type=jnp.float32) + bqkv_ref[...]

    # ---- per-head masked softmax attention (score/context are inherently per-head) ----
    ctx_heads = []
    for h in range(num_heads):                          # static unroll, tiny operands
        q = qkv[:, h * dh:(h + 1) * dh].astype(jnp.bfloat16)
        k = qkv[:, H + h * dh: H + (h + 1) * dh].astype(jnp.bfloat16)
        v = qkv[:, 2 * H + h * dh: 2 * H + (h + 1) * dh].astype(jnp.bfloat16)

        s = jnp.einsum("qd,kd->qk", q, k,
                       preferred_element_type=jnp.float32) * scale + bias   # (S, S)
        m = jnp.max(s, axis=-1, keepdims=True)
        e = jnp.exp(s - m)
        p_attn = e * pl.reciprocal(jnp.sum(e, axis=-1, keepdims=True), approx=True)

        ctx_heads.append(jnp.dot(p_attn.astype(jnp.bfloat16), v,
                                 preferred_element_type=jnp.float32))        # (S, dh)
    ctx = jnp.concatenate(ctx_heads, axis=-1)            # (S, H)

    # ---- fused output projection + residual + LayerNorm ----
    y = (jnp.dot(ctx.astype(jnp.bfloat16), wo_ref[...],
                 preferred_element_type=jnp.float32) + bo_ref[...] + x)
    x1 = _layernorm(y, g1_ref[...], b1_ref[...])          # f32 (S, H)

    # ---- FFN: dense -> exact erf-GELU (HF BERT) -> dense + residual + LayerNorm ----
    hmid = (jnp.dot(x1.astype(jnp.bfloat16), wi_ref[...],
                    preferred_element_type=jnp.float32) + bi_ref[...])
    hmid = hmid * 0.5 * (1.0 + _erf(hmid * (1.0 / math.sqrt(2.0))))
    y2 = (jnp.dot(hmid.astype(jnp.bfloat16), wo2_ref[...],
                  preferred_element_type=jnp.float32) + bo2_ref[...] + x1)
    o_ref[...] = _layernorm(y2, g2_ref[...], b2_ref[...]).astype(o_ref.dtype)


def _head_kernel(cls_ref, pw_ref, pb_ref, fw_ref, fb_ref, o_ref):
    pooled = jnp.tanh(jnp.dot(cls_ref[...], pw_ref[...],
                              preferred_element_type=jnp.float32) + pb_ref[...])
    # Dropout(p=0.2) on pooler_output: identity at inference (eval mode).
    logits = jnp.dot(pooled.astype(jnp.bfloat16), fw_ref[...],
                     preferred_element_type=jnp.float32) + fb_ref[...]
    m = jnp.max(logits, axis=-1, keepdims=True)
    e = jnp.exp(logits - m)
    o_ref[...] = (e / jnp.sum(e, axis=-1, keepdims=True)).astype(o_ref.dtype)  # exact divide


# ---------------------------------------------------------------------------------- wrappers

def embed_layernorm(x, gamma, beta, row_tile=512):
    M, H = x.shape
    row_tile = min(row_tile, M)
    if M % row_tile != 0:
        row_tile = M
    return pl.pallas_call(
        _emb_ln_kernel,
        out_shape=jax.ShapeDtypeStruct((M, H), jnp.bfloat16),
        grid=(M // row_tile,),
        in_specs=[
            pl.BlockSpec((row_tile, H), lambda i: (i, 0)),
            pl.BlockSpec((1, H), lambda i: (0, 0)),
            pl.BlockSpec((1, H), lambda i: (0, 0)),
        ],
        out_specs=pl.BlockSpec((row_tile, H), lambda i: (i, 0)),
        compiler_params=pltpu.CompilerParams(dimension_semantics=("parallel",)),
    )(x, gamma, beta)


def encoder_layer(x, bias, lw, *, batch, seq, num_heads):
    M, H = x.shape                    # M = batch * seq
    threeH = lw["wqkv"].shape[1]
    I = lw["wi"].shape[1]
    dh = H // num_heads
    kern = functools.partial(_encoder_layer_kernel, num_heads=num_heads,
                             scale=1.0 / math.sqrt(dh))
    return pl.pallas_call(
        kern,
        out_shape=jax.ShapeDtypeStruct((M, H), jnp.bfloat16),
        grid=(batch,),
        in_specs=[
            pl.BlockSpec((seq, H), lambda b: (b, 0)),           # x rows for batch b
            pl.BlockSpec((1, 1, seq), lambda b: (b, 0, 0)),     # additive mask bias
            pl.BlockSpec((H, threeH), lambda b: (0, 0)),        # fused Wqkv (bf16)
            pl.BlockSpec((1, threeH), lambda b: (0, 0)),        # fused bqkv (f32)
            pl.BlockSpec((H, H), lambda b: (0, 0)),             # Wo (bf16)
            pl.BlockSpec((1, H), lambda b: (0, 0)),             # bo
            pl.BlockSpec((1, H), lambda b: (0, 0)),             # ln1 gamma
            pl.BlockSpec((1, H), lambda b: (0, 0)),             # ln1 beta
            pl.BlockSpec((H, I), lambda b: (0, 0)),             # Wi (bf16)
            pl.BlockSpec((1, I), lambda b: (0, 0)),             # bi
            pl.BlockSpec((I, H), lambda b: (0, 0)),             # Wo2 (bf16)
            pl.BlockSpec((1, H), lambda b: (0, 0)),             # bo2
            pl.BlockSpec((1, H), lambda b: (0, 0)),             # ln2 gamma
            pl.BlockSpec((1, H), lambda b: (0, 0)),             # ln2 beta
        ],
        out_specs=pl.BlockSpec((seq, H), lambda b: (b, 0)),
        compiler_params=pltpu.CompilerParams(dimension_semantics=("parallel",)),
    )(x, bias, lw["wqkv"], lw["bqkv"], lw["wo"], lw["bo"], lw["ln1_g"], lw["ln1_b"],
      lw["wi"], lw["bi"], lw["wo2"], lw["bo2"], lw["ln2_g"], lw["ln2_b"])


def pooler_classifier(cls, pw, pb, fw, fb):
    B, H = cls.shape
    C = fw.shape[1]
    return pl.pallas_call(
        _head_kernel,
        out_shape=jax.ShapeDtypeStruct((B, C), jnp.float32),
        in_specs=[pl.BlockSpec(memory_space=pltpu.MemorySpace.VMEM)] * 5,
        out_specs=pl.BlockSpec(memory_space=pltpu.MemorySpace.VMEM),
    )(cls, pw, pb, fw, fb)


# --------------------------------------------------------------------------- parameters

CFG = dict(vocab=100, hidden=32, heads=4, layers=2, intermediate=64,
           max_pos=16, type_vocab=2, num_class=4, batch=2, seq=8)


def init_params(key, cfg):
    """PyTorch-like f32 parameters (Wq/Wk/Wv/Wo/FFN/LN per layer)."""
    keys = iter(jax.random.split(key, 128))

    def nrm(shape):
        return jax.random.normal(next(keys), shape, jnp.float32) * 0.02

    H, I = cfg["hidden"], cfg["intermediate"]
    params = dict(
        word_emb=nrm((cfg["vocab"], H)),
        pos_emb=nrm((cfg["max_pos"], H)),
        type_emb=nrm((cfg["type_vocab"], H)),
        emb_ln_g=jnp.ones((H,), jnp.float32),
        emb_ln_b=jnp.zeros((H,), jnp.float32),
        pooler_w=nrm((H, H)),
        pooler_b=jnp.zeros((H,), jnp.float32),
        fc_w=nrm((H, cfg["num_class"])),
        fc_b=jnp.zeros((cfg["num_class"],), jnp.float32),
        layers=[],
    )
    for _ in range(cfg["layers"]):
        params["layers"].append(dict(
            wq=nrm((H, H)), bq=jnp.zeros((H,), jnp.float32),
            wk=nrm((H, H)), bk=jnp.zeros((H,), jnp.float32),
            wv=nrm((H, H)), bv=jnp.zeros((H,), jnp.float32),
            wo=nrm((H, H)), bo=jnp.zeros((H,), jnp.float32),
            ln1_g=jnp.ones((H,), jnp.float32), ln1_b=jnp.zeros((H,), jnp.float32),
            wi=nrm((H, I)), bi=jnp.zeros((I,), jnp.float32),
            wo2=nrm((I, H)), bo2=jnp.zeros((H,), jnp.float32),
            ln2_g=jnp.ones((H,), jnp.float32), ln2_b=jnp.zeros((H,), jnp.float32),
        ))
    return params


def pack_params(params, cfg):
    """One-off (outside jit) repack: fuse QKV, cast matmul weights to bf16, reshape biases."""
    H, I, C = cfg["hidden"], cfg["intermediate"], cfg["num_class"]
    packed = dict(
        word_emb=params["word_emb"], pos_emb=params["pos_emb"], type_emb=params["type_emb"],
        emb_ln_g=params["emb_ln_g"].reshape(1, H), emb_ln_b=params["emb_ln_b"].reshape(1, H),
        pooler_w=params["pooler_w"].astype(jnp.bfloat16),
        pooler_b=params["pooler_b"].reshape(1, H),
        fc_w=params["fc_w"].astype(jnp.bfloat16),
        fc_b=params["fc_b"].reshape(1, C),
        layers=[],
    )
    for lp in params["layers"]:
        packed["layers"].append(dict(
            wqkv=jnp.concatenate([lp["wq"], lp["wk"], lp["wv"]], axis=1).astype(jnp.bfloat16),
            bqkv=jnp.concatenate([lp["bq"], lp["bk"], lp["bv"]]).reshape(1, 3 * H),
            wo=lp["wo"].astype(jnp.bfloat16), bo=lp["bo"].reshape(1, H),
            ln1_g=lp["ln1_g"].reshape(1, H), ln1_b=lp["ln1_b"].reshape(1, H),
            wi=lp["wi"].astype(jnp.bfloat16), bi=lp["bi"].reshape(1, I),
            wo2=lp["wo2"].astype(jnp.bfloat16), bo2=lp["bo2"].reshape(1, H),
            ln2_g=lp["ln2_g"].reshape(1, H), ln2_b=lp["ln2_b"].reshape(1, H),
        ))
    return packed


# ------------------------------------------------------------------------------ forward

def bert_base_forward(packed, input_ids, attention_mask, token_type_ids, cfg=CFG):
    """Equivalent of Bert_base.forward(input_ids, attention_mask, token_type_ids), labels=None."""
    B, S = input_ids.shape
    H, nH = cfg["hidden"], cfg["heads"]

    # embeddings (gather = plain-JAX glue) + LayerNorm kernel (bf16 out)
    x = (packed["word_emb"][input_ids]
         + packed["pos_emb"][:S][None, :, :]
         + packed["type_emb"][token_type_ids])
    x = embed_layernorm(x.reshape(B * S, H), packed["emb_ln_g"], packed["emb_ln_b"])

    # additive attention-mask bias, shaped (B, 1, S) for per-batch BlockSpec tiling
    bias = ((1.0 - attention_mask.astype(jnp.float32)) * -1e9).reshape(B, 1, S)

    for lw in packed["layers"]:
        x = encoder_layer(x, bias, lw, batch=B, seq=S, num_heads=nH)

    # pooler(tanh) + dropout(eval=identity) + classifier + softmax fused in one kernel
    cls = x.reshape(B, S, H)[:, 0, :]
    out = pooler_classifier(cls, packed["pooler_w"], packed["pooler_b"],
                            packed["fc_w"], packed["fc_b"])
    # TODO(synk): labels/criterion loss path not implemented (criterion module unspecified).
    return out


# -------------------------------------------------------------------------------- main

if __name__ == "__main__":
    key = jax.random.PRNGKey(0)
    pkey, ikey, tkey = jax.random.split(key, 3)

    params = init_params(pkey, CFG)
    packed = pack_params(params, CFG)     # one-off repack, outside jit

    B, S = CFG["batch"], CFG["seq"]
    input_ids = jax.random.randint(ikey, (B, S), 0, CFG["vocab"], dtype=jnp.int32)
    token_type_ids = jax.random.randint(tkey, (B, S), 0, CFG["type_vocab"], dtype=jnp.int32)
    # second sequence has two padded positions to exercise the attention mask
    attention_mask = jnp.array([[1] * S, [1] * (S - 2) + [0, 0]], dtype=jnp.int32)

    fwd = jax.jit(functools.partial(bert_base_forward, cfg=CFG))
    out = fwd(packed, input_ids, attention_mask, token_type_ids)
    out = jax.block_until_ready(out)

    assert out.shape == (B, CFG["num_class"])
    assert bool(jnp.all(jnp.isfinite(out)))
    # rows must sum to 1 (softmax over classes)
    assert bool(jnp.allclose(jnp.sum(out, axis=1), 1.0, atol=1e-5))
    print("KERNEL_OK")
</pallas_src>

<mosaic_0001>
module attributes {stable_mosaic.version = 11 : i64} {
  func.func @_emb_ln_kernel(%arg0: i32, %arg1: memref<16x32xf32, #tpu.memory_space<vmem>>, %arg2: memref<1x32xf32, #tpu.memory_space<vmem>>, %arg3: memref<1x32xf32, #tpu.memory_space<vmem>>, %arg4: memref<16x32xbf16, #tpu.memory_space<vmem>>) attributes {dimension_semantics = [#tpu.dimension_semantics<parallel>], iteration_bounds = array<i64: 1>, scalar_prefetch = 0 : i64, scratch_operands = 0 : i64, tpu.core_type = #tpu.core_type<tc>, window_params = [{transform_indices = @transform_0, window_bounds = array<i64: 16, 32>}, {pipeline_mode = #tpu.pipeline_mode<synchronous>, transform_indices = @transform_1, window_bounds = array<i64: 1, 32>}, {pipeline_mode = #tpu.pipeline_mode<synchronous>, transform_indices = @transform_2, window_bounds = array<i64: 1, 32>}, {transform_indices = @transform_3, window_bounds = array<i64: 16, 32>}]} {
    %c0 = arith.constant 0 : index
    %c0_0 = arith.constant 0 : index
    %0 = vector.load %arg1[%c0, %c0_0] : memref<16x32xf32, #tpu.memory_space<vmem>>, vector<16x32xf32>
    %c0_1 = arith.constant 0 : index
    %c0_2 = arith.constant 0 : index
    %1 = vector.load %arg2[%c0_1, %c0_2] : memref<1x32xf32, #tpu.memory_space<vmem>>, vector<1x32xf32>
    %c0_3 = arith.constant 0 : index
    %c0_4 = arith.constant 0 : index
    %2 = vector.load %arg3[%c0_3, %c0_4] : memref<1x32xf32, #tpu.memory_space<vmem>>, vector<1x32xf32>
    %cst = arith.constant dense<0.000000e+00> : vector<16xf32>
    %3 = vector.multi_reduction <add>, %0, %cst [1] : vector<16x32xf32> to vector<16xf32>
    %4 = vector.shape_cast %3 : vector<16xf32> to vector<16x1xf32>
    %cst_5 = arith.constant 3.200000e+01 : f32
    %5 = vector.broadcast %cst_5 : f32 to vector<16x1xf32>
    %6 = arith.divf %4, %5 : vector<16x1xf32>
    %7 = vector.broadcast %6 : vector<16x1xf32> to vector<16x32xf32>
    %8 = arith.subf %0, %7 : vector<16x32xf32>
    %9 = arith.mulf %8, %8 : vector<16x32xf32>
    %cst_6 = arith.constant dense<0.000000e+00> : vector<16xf32>
    %10 = vector.multi_reduction <add>, %9, %cst_6 [1] : vector<16x32xf32> to vector<16xf32>
    %11 = vector.shape_cast %10 : vector<16xf32> to vector<16x1xf32>
    %cst_7 = arith.constant 3.200000e+01 : f32
    %12 = vector.broadcast %cst_7 : f32 to vector<16x1xf32>
    %13 = arith.divf %11, %12 : vector<16x1xf32>
    %cst_8 = arith.constant 9.99999996E-13 : f32
    %14 = vector.broadcast %cst_8 : f32 to vector<16x1xf32>
    %15 = arith.addf %13, %14 : vector<16x1xf32>
    %16 = math.rsqrt %15 : vector<16x1xf32>
    %17 = vector.broadcast %16 : vector<16x1xf32> to vector<16x32xf32>
    %18 = arith.mulf %8, %17 : vector<16x32xf32>
    %19 = vector.broadcast %1 : vector<1x32xf32> to vector<16x32xf32>
    %20 = arith.mulf %18, %19 : vector<16x32xf32>
    %21 = vector.broadcast %2 : vector<1x32xf32> to vector<16x32xf32>
    %22 = arith.addf %20, %21 : vector<16x32xf32>
    %23 = arith.truncf %22 : vector<16x32xf32> to vector<16x32xbf16>
    %c0_9 = arith.constant 0 : index
    %c0_10 = arith.constant 0 : index
    %24 = vector.load %arg4[%c0_9, %c0_10] : memref<16x32xbf16, #tpu.memory_space<vmem>>, vector<16x32xbf16>
    tpu.vector_store %arg4[%c0_9, %c0_10], %23 {strides = array<i32>} : memref<16x32xbf16, #tpu.memory_space<vmem>>, vector<16x32xbf16>,
    return
  }
  func.func @transform_0(%arg0: i32) -> (i32, i32) {
    %c0_i32 = arith.constant 0 : i32
    %c0_i32_0 = arith.constant 0 : i32
    return %arg0, %c0_i32 : i32, i32
  }
  func.func @transform_1(%arg0: i32) -> (i32, i32) {
    %c0_i32 = arith.constant 0 : i32
    %c0_i32_0 = arith.constant 0 : i32
    %c0_i32_1 = arith.constant 0 : i32
    return %c0_i32, %c0_i32_0 : i32, i32
  }
  func.func @transform_2(%arg0: i32) -> (i32, i32) {
    %c0_i32 = arith.constant 0 : i32
    %c0_i32_0 = arith.constant 0 : i32
    %c0_i32_1 = arith.constant 0 : i32
    return %c0_i32, %c0_i32_0 : i32, i32
  }
  func.func @transform_3(%arg0: i32) -> (i32, i32) {
    %c0_i32 = arith.constant 0 : i32
    %c0_i32_0 = arith.constant 0 : i32
    return %arg0, %c0_i32 : i32, i32
  }
}

module attributes {stable_mosaic.version = 11 : i64} {
  func.func @_head_kernel(%arg0: memref<2x32xbf16, #tpu.memory_space<vmem>>, %arg1: memref<32x32xbf16, #tpu.memory_space<vmem>>, %arg2: memref<1x32xf32, #tpu.memory_space<vmem>>, %arg3: memref<32x4xbf16, #tpu.memory_space<vmem>>, %arg4: memref<1x4xf32, #tpu.memory_space<vmem>>, %arg5: memref<2x4xf32, #tpu.memory_space<vmem>>) attributes {dimension_semantics = [], scalar_prefetch = 0 : i64, scratch_operands = 0 : i64, tpu.core_type = #tpu.core_type<tc>} {
    %c0 = arith.constant 0 : index
    %c0_0 = arith.constant 0 : index
    %0 = vector.load %arg0[%c0, %c0_0] : memref<2x32xbf16, #tpu.memory_space<vmem>>, vector<2x32xbf16>
    %c0_1 = arith.constant 0 : index
    %c0_2 = arith.constant 0 : index
    %1 = vector.load %arg1[%c0_1, %c0_2] : memref<32x32xbf16, #tpu.memory_space<vmem>>, vector<32x32xbf16>
    %cst = arith.constant dense<0.000000e+00> : vector<2x32xf32>
    %2 = tpu.matmul %0, %1, %cst {dimension_numbers = #tpu.dot_dimension_numbers<[1], [0], [0], [1], [0, 0, 1, 1], [], []>} : vector<2x32xbf16>, vector<32x32xbf16>, vector<2x32xf32> -> vector<2x32xf32>
    %c0_3 = arith.constant 0 : index
    %c0_4 = arith.constant 0 : index
    %3 = vector.load %arg2[%c0_3, %c0_4] : memref<1x32xf32, #tpu.memory_space<vmem>>, vector<1x32xf32>
    %4 = vector.broadcast %3 : vector<1x32xf32> to vector<2x32xf32>
    %5 = arith.addf %2, %4 : vector<2x32xf32>
    %6 = math.tanh %5 : vector<2x32xf32>
    %7 = arith.truncf %6 : vector<2x32xf32> to vector<2x32xbf16>
    %c0_5 = arith.constant 0 : index
    %c0_6 = arith.constant 0 : index
    %8 = vector.load %arg3[%c0_5, %c0_6] : memref<32x4xbf16, #tpu.memory_space<vmem>>, vector<32x4xbf16>
    %cst_7 = arith.constant dense<0.000000e+00> : vector<2x4xf32>
    %9 = tpu.matmul %7, %8, %cst_7 {dimension_numbers = #tpu.dot_dimension_numbers<[1], [0], [0], [1], [0, 0, 1, 1], [], []>} : vector<2x32xbf16>, vector<32x4xbf16>, vector<2x4xf32> -> vector<2x4xf32>
    %c0_8 = arith.constant 0 : index
    %c0_9 = arith.constant 0 : index
    %10 = vector.load %arg4[%c0_8, %c0_9] : memref<1x4xf32, #tpu.memory_space<vmem>>, vector<1x4xf32>
    %11 = vector.broadcast %10 : vector<1x4xf32> to vector<2x4xf32>
    %12 = arith.addf %9, %11 : vector<2x4xf32>
    %cst_10 = arith.constant dense<0xFF800000> : vector<2xf32>
    %13 = vector.multi_reduction <maximumf>, %12, %cst_10 [1] : vector<2x4xf32> to vector<2xf32>
    %14 = vector.shape_cast %13 : vector<2xf32> to vector<2x1xf32>
    %15 = vector.broadcast %14 : vector<2x1xf32> to vector<2x4xf32>
    %16 = arith.subf %12, %15 : vector<2x4xf32>
    %17 = math.exp %16 : vector<2x4xf32>
    %cst_11 = arith.constant dense<0.000000e+00> : vector<2xf32>
    %18 = vector.multi_reduction <add>, %17, %cst_11 [1] : vector<2x4xf32> to vector<2xf32>
    %19 = vector.shape_cast %18 : vector<2xf32> to vector<2x1xf32>
    %20 = vector.broadcast %19 : vector<2x1xf32> to vector<2x4xf32>
    %21 = arith.divf %17, %20 : vector<2x4xf32>
    %c0_12 = arith.constant 0 : index
    %c0_13 = arith.constant 0 : index
    %22 = vector.load %arg5[%c0_12, %c0_13] : memref<2x4xf32, #tpu.memory_space<vmem>>, vector<2x4xf32>
    tpu.vector_store %arg5[%c0_12, %c0_13], %21 {strides = array<i32>} : memref<2x4xf32, #tpu.memory_space<vmem>>, vector<2x4xf32>,
    return
  }
}

module attributes {stable_mosaic.version = 11 : i64} {
  func.func @_encoder_layer_kernel(%arg0: i32, %arg1: memref<8x32xbf16, #tpu.memory_space<vmem>>, %arg2: memref<1x1x8xf32, #tpu.memory_space<vmem>>, %arg3: memref<32x96xbf16, #tpu.memory_space<vmem>>, %arg4: memref<1x96xf32, #tpu.memory_space<vmem>>, %arg5: memref<32x32xbf16, #tpu.memory_space<vmem>>, %arg6: memref<1x32xf32, #tpu.memory_space<vmem>>, %arg7: memref<1x32xf32, #tpu.memory_space<vmem>>, %arg8: memref<1x32xf32, #tpu.memory_space<vmem>>, %arg9: memref<32x64xbf16, #tpu.memory_space<vmem>>, %arg10: memref<1x64xf32, #tpu.memory_space<vmem>>, %arg11: memref<64x32xbf16, #tpu.memory_space<vmem>>, %arg12: memref<1x32xf32, #tpu.memory_space<vmem>>, %arg13: memref<1x32xf32, #tpu.memory_space<vmem>>, %arg14: memref<1x32xf32, #tpu.memory_space<vmem>>, %arg15: memref<8x32xbf16, #tpu.memory_space<vmem>>) attributes {dimension_semantics = [#tpu.dimension_semantics<parallel>], iteration_bounds = array<i64: 2>, scalar_prefetch = 0 : i64, scratch_operands = 0 : i64, tpu.core_type = #tpu.core_type<tc>, window_params = [{transform_indices = @transform_0, window_bounds = array<i64: 8, 32>}, {transform_indices = @transform_1, window_bounds = array<i64: 1, 1, 8>}, {pipeline_mode = #tpu.pipeline_mode<synchronous>, transform_indices = @transform_2, window_bounds = array<i64: 32, 96>}, {pipeline_mode = #tpu.pipeline_mode<synchronous>, transform_indices = @transform_3, window_bounds = array<i64: 1, 96>}, {pipeline_mode = #tpu.pipeline_mode<synchronous>, transform_indices = @transform_4, window_bounds = array<i64: 32, 32>}, {pipeline_mode = #tpu.pipeline_mode<synchronous>, transform_indices = @transform_5, window_bounds = array<i64: 1, 32>}, {pipeline_mode = #tpu.pipeline_mode<synchronous>, transform_indices = @transform_6, window_bounds = array<i64: 1, 32>}, {pipeline_mode = #tpu.pipeline_mode<synchronous>, transform_indices = @transform_7, window_bounds = array<i64: 1, 32>}, {pipeline_mode = #tpu.pipeline_mode<synchronous>, transform_indices = @transform_8, window_bounds = array<i64: 32, 64>}, {pipeline_mode = #tpu.pipeline_mode<synchronous>, transform_indices = @transform_9, window_bounds = array<i64: 1, 64>}, {pipeline_mode = #tpu.pipeline_mode<synchronous>, transform_indices = @transform_10, window_bounds = array<i64: 64, 32>}, {pipeline_mode = #tpu.pipeline_mode<synchronous>, transform_indices = @transform_11, window_bounds = array<i64: 1, 32>}, {pipeline_mode = #tpu.pipeline_mode<synchronous>, transform_indices = @transform_12, window_bounds = array<i64: 1, 32>}, {pipeline_mode = #tpu.pipeline_mode<synchronous>, transform_indices = @transform_13, window_bounds = array<i64: 1, 32>}, {transform_indices = @transform_14, window_bounds = array<i64: 8, 32>}]} {
    %c0 = arith.constant 0 : index
    %c0_0 = arith.constant 0 : index
    %0 = vector.load %arg1[%c0, %c0_0] : memref<8x32xbf16, #tpu.memory_space<vmem>>, vector<8x32xbf16>
    %1 = arith.extf %0 : vector<8x32xbf16> to vector<8x32xf32>
    %c0_1 = arith.constant 0 : index
    %c0_2 = arith.constant 0 : index
    %c0_3 = arith.constant 0 : index
    %2 = vector.load %arg2[%c0_1, %c0_2, %c0_3] : memref<1x1x8xf32, #tpu.memory_space<vmem>>, vector<1x1x8xf32>
    %3 = vector.shape_cast %2 : vector<1x1x8xf32> to vector<1x8xf32>
    %c0_4 = arith.constant 0 : index
    %c0_5 = arith.constant 0 : index
    %4 = vector.load %arg3[%c0_4, %c0_5] : memref<32x96xbf16, #tpu.memory_space<vmem>>, vector<32x96xbf16>
    %cst = arith.constant dense<0.000000e+00> : vector<8x96xf32>
    %5 = tpu.matmul %0, %4, %cst {dimension_numbers = #tpu.dot_dimension_numbers<[1], [0], [0], [1], [0, 0, 1, 1], [], []>} : vector<8x32xbf16>, vector<32x96xbf16>, vector<8x96xf32> -> vector<8x96xf32>
    %c0_6 = arith.constant 0 : index
    %c0_7 = arith.constant 0 : index
    %6 = vector.load %arg4[%c0_6, %c0_7] : memref<1x96xf32, #tpu.memory_space<vmem>>, vector<1x96xf32>
    %7 = vector.broadcast %6 : vector<1x96xf32> to vector<8x96xf32>
    %8 = arith.addf %5, %7 : vector<8x96xf32>
    %9 = vector.extract_strided_slice %8 {offsets = [0, 0], sizes = [8, 8], strides = [1, 1]} : vector<8x96xf32> to vector<8x8xf32>
    %10 = arith.truncf %9 : vector<8x8xf32> to vector<8x8xbf16>
    %11 = vector.extract_strided_slice %8 {offsets = [0, 32], sizes = [8, 8], strides = [1, 1]} : vector<8x96xf32> to vector<8x8xf32>
    %12 = arith.truncf %11 : vector<8x8xf32> to vector<8x8xbf16>
    %13 = vector.extract_strided_slice %8 {offsets = [0, 64], sizes = [8, 8], strides = [1, 1]} : vector<8x96xf32> to vector<8x8xf32>
    %14 = arith.truncf %13 : vector<8x8xf32> to vector<8x8xbf16>
    "tpu.trace_start"() <{level = 10 : i32, message = "qd,kd->qk"}> : () -> ()
    %cst_8 = arith.constant dense<0.000000e+00> : vector<8x8xf32>
    %15 = tpu.matmul %10, %12, %cst_8 {dimension_numbers = #tpu.dot_dimension_numbers<[1], [1], [0], [0], [0, 0, 1, 0], [], []>} : vector<8x8xbf16>, vector<8x8xbf16>, vector<8x8xf32> -> vector<8x8xf32>
    "tpu.trace_stop"() : () -> ()
    %cst_9 = arith.constant 0.353553385 : f32
    %16 = vector.broadcast %cst_9 : f32 to vector<8x8xf32>
    %17 = arith.mulf %15, %16 : vector<8x8xf32>
    %18 = vector.broadcast %3 : vector<1x8xf32> to vector<8x8xf32>
    %19 = arith.addf %17, %18 : vector<8x8xf32>
    %cst_10 = arith.constant dense<0xFF800000> : vector<8xf32>
    %20 = vector.multi_reduction <maximumf>, %19, %cst_10 [1] : vector<8x8xf32> to vector<8xf32>
    %21 = vector.shape_cast %20 : vector<8xf32> to vector<8x1xf32>
    %22 = vector.broadcast %21 : vector<8x1xf32> to vector<8x8xf32>
    %23 = arith.subf %19, %22 : vector<8x8xf32>
    %24 = math.exp %23 : vector<8x8xf32>
    %cst_11 = arith.constant dense<0.000000e+00> : vector<8xf32>
    %25 = vector.multi_reduction <add>, %24, %cst_11 [1] : vector<8x8xf32> to vector<8xf32>
    %26 = vector.shape_cast %25 : vector<8xf32> to vector<8x1xf32>
    %27 = tpu.reciprocal %26 {approx = true} : vector<8x1xf32> -> vector<8x1xf32>
    %28 = vector.broadcast %27 : vector<8x1xf32> to vector<8x8xf32>
    %29 = arith.mulf %24, %28 : vector<8x8xf32>
    %30 = arith.truncf %29 : vector<8x8xf32> to vector<8x8xbf16>
    %cst_12 = arith.constant dense<0.000000e+00> : vector<8x8xf32>
    %31 = tpu.matmul %30, %14, %cst_12 {dimension_numbers = #tpu.dot_dimension_numbers<[1], [0], [0], [1], [0, 0, 1, 1], [], []>} : vector<8x8xbf16>, vector<8x8xbf16>, vector<8x8xf32> -> vector<8x8xf32>
    %32 = vector.extract_strided_slice %8 {offsets = [0, 8], sizes = [8, 8], strides = [1, 1]} : vector<8x96xf32> to vector<8x8xf32>
    %33 = arith.truncf %32 : vector<8x8xf32> to vector<8x8xbf16>
    %34 = vector.extract_strided_slice %8 {offsets = [0, 40], sizes = [8, 8], strides = [1, 1]} : vector<8x96xf32> to vector<8x8xf32>
    %35 = arith.truncf %34 : vector<8x8xf32> to vector<8x8xbf16>
    %36 = vector.extract_strided_slice %8 {offsets = [0, 72], sizes = [8, 8], strides = [1, 1]} : vector<8x96xf32> to vector<8x8xf32>
    %37 = arith.truncf %36 : vector<8x8xf32> to vector<8x8xbf16>
    "tpu.trace_start"() <{level = 10 : i32, message = "qd,kd->qk"}> : () -> ()
    %cst_13 = arith.constant dense<0.000000e+00> : vector<8x8xf32>
    %38 = tpu.matmul %33, %35, %cst_13 {dimension_numbers = #tpu.dot_dimension_numbers<[1], [1], [0], [0], [0, 0, 1, 0], [], []>} : vector<8x8xbf16>, vector<8x8xbf16>, vector<8x8xf32> -> vector<8x8xf32>
    "tpu.trace_stop"() : () -> ()
    %cst_14 = arith.constant 0.353553385 : f32
    %39 = vector.broadcast %cst_14 : f32 to vector<8x8xf32>
    %40 = arith.mulf %38, %39 : vector<8x8xf32>
    %41 = vector.broadcast %3 : vector<1x8xf32> to vector<8x8xf32>
    %42 = arith.addf %40, %41 : vector<8x8xf32>
    %cst_15 = arith.constant dense<0xFF800000> : vector<8xf32>
    %43 = vector.multi_reduction <maximumf>, %42, %cst_15 [1] : vector<8x8xf32> to vector<8xf32>
    %44 = vector.shape_cast %43 : vector<8xf32> to vector<8x1xf32>
    %45 = vector.broadcast %44 : vector<8x1xf32> to vector<8x8xf32>
    %46 = arith.subf %42, %45 : vector<8x8xf32>
    %47 = math.exp %46 : vector<8x8xf32>
    %cst_16 = arith.constant dense<0.000000e+00> : vector<8xf32>
    %48 = vector.multi_reduction <add>, %47, %cst_16 [1] : vector<8x8xf32> to vector<8xf32>
    %49 = vector.shape_cast %48 : vector<8xf32> to vector<8x1xf32>
    %50 = tpu.reciprocal %49 {approx = true} : vector<8x1xf32> -> vector<8x1xf32>
    %51 = vector.broadcast %50 : vector<8x1xf32> to vector<8x8xf32>
    %52 = arith.mulf %47, %51 : vector<8x8xf32>
    %53 = arith.truncf %52 : vector<8x8xf32> to vector<8x8xbf16>
    %cst_17 = arith.constant dense<0.000000e+00> : vector<8x8xf32>
    %54 = tpu.matmul %53, %37, %cst_17 {dimension_numbers = #tpu.dot_dimension_numbers<[1], [0], [0], [1], [0, 0, 1, 1], [], []>} : vector<8x8xbf16>, vector<8x8xbf16>, vector<8x8xf32> -> vector<8x8xf32>
    %55 = vector.extract_strided_slice %8 {offsets = [0, 16], sizes = [8, 8], strides = [1, 1]} : vector<8x96xf32> to vector<8x8xf32>
    %56 = arith.truncf %55 : vector<8x8xf32> to vector<8x8xbf16>
    %57 = vector.extract_strided_slice %8 {offsets = [0, 48], sizes = [8, 8], strides = [1, 1]} : vector<8x96xf32> to vector<8x8xf32>
    %58 = arith.truncf %57 : vector<8x8xf32> to vector<8x8xbf16>
    %59 = vector.extract_strided_slice %8 {offsets = [0, 80], sizes = [8, 8], strides = [1, 1]} : vector<8x96xf32> to vector<8x8xf32>
    %60 = arith.truncf %59 : vector<8x8xf32> to vector<8x8xbf16>
    "tpu.trace_start"() <{level = 10 : i32, message = "qd,kd->qk"}> : () -> ()
    %cst_18 = arith.constant dense<0.000000e+00> : vector<8x8xf32>
    %61 = tpu.matmul %56, %58, %cst_18 {dimension_numbers = #tpu.dot_dimension_numbers<[1], [1], [0], [0], [0, 0, 1, 0], [], []>} : vector<8x8xbf16>, vector<8x8xbf16>, vector<8x8xf32> -> vector<8x8xf32>
    "tpu.trace_stop"() : () -> ()
    %cst_19 = arith.constant 0.353553385 : f32
    %62 = vector.broadcast %cst_19 : f32 to vector<8x8xf32>
    %63 = arith.mulf %61, %62 : vector<8x8xf32>
    %64 = vector.broadcast %3 : vector<1x8xf32> to vector<8x8xf32>
    %65 = arith.addf %63, %64 : vector<8x8xf32>
    %cst_20 = arith.constant dense<0xFF800000> : vector<8xf32>
    %66 = vector.multi_reduction <maximumf>, %65, %cst_20 [1] : vector<8x8xf32> to vector<8xf32>
    %67 = vector.shape_cast %66 : vector<8xf32> to vector<8x1xf32>
    %68 = vector.broadcast %67 : vector<8x1xf32> to vector<8x8xf32>
    %69 = arith.subf %65, %68 : vector<8x8xf32>
    %70 = math.exp %69 : vector<8x8xf32>
    %cst_21 = arith.constant dense<0.000000e+00> : vector<8xf32>
    %71 = vector.multi_reduction <add>, %70, %cst_21 [1] : vector<8x8xf32> to vector<8xf32>
    %72 = vector.shape_cast %71 : vector<8xf32> to vector<8x1xf32>
    %73 = tpu.reciprocal %72 {approx = true} : vector<8x1xf32> -> vector<8x1xf32>
    %74 = vector.broadcast %73 : vector<8x1xf32> to vector<8x8xf32>
    %75 = arith.mulf %70, %74 : vector<8x8xf32>
    %76 = arith.truncf %75 : vector<8x8xf32> to vector<8x8xbf16>
    %cst_22 = arith.constant dense<0.000000e+00> : vector<8x8xf32>
    %77 = tpu.matmul %76, %60, %cst_22 {dimension_numbers = #tpu.dot_dimension_numbers<[1], [0], [0], [1], [0, 0, 1, 1], [], []>} : vector<8x8xbf16>, vector<8x8xbf16>, vector<8x8xf32> -> vector<8x8xf32>
    %78 = vector.extract_strided_slice %8 {offsets = [0, 24], sizes = [8, 8], strides = [1, 1]} : vector<8x96xf32> to vector<8x8xf32>
    %79 = arith.truncf %78 : vector<8x8xf32> to vector<8x8xbf16>
    %80 = vector.extract_strided_slice %8 {offsets = [0, 56], sizes = [8, 8], strides = [1, 1]} : vector<8x96xf32> to vector<8x8xf32>
    %81 = arith.truncf %80 : vector<8x8xf32> to vector<8x8xbf16>
    %82 = vector.extract_strided_slice %8 {offsets = [0, 88], sizes = [8, 8], strides = [1, 1]} : vector<8x96xf32> to vector<8x8xf32>
    %83 = arith.truncf %82 : vector<8x8xf32> to vector<8x8xbf16>
    "tpu.trace_start"() <{level = 10 : i32, message = "qd,kd->qk"}> : () -> ()
    %cst_23 = arith.constant dense<0.000000e+00> : vector<8x8xf32>
    %84 = tpu.matmul %79, %81, %cst_23 {dimension_numbers = #tpu.dot_dimension_numbers<[1], [1], [0], [0], [0, 0, 1, 0], [], []>} : vector<8x8xbf16>, vector<8x8xbf16>, vector<8x8xf32> -> vector<8x8xf32>
    "tpu.trace_stop"() : () -> ()
    %cst_24 = arith.constant 0.353553385 : f32
    %85 = vector.broadcast %cst_24 : f32 to vector<8x8xf32>
    %86 = arith.mulf %84, %85 : vector<8x8xf32>
    %87 = vector.broadcast %3 : vector<1x8xf32> to vector<8x8xf32>
    %88 = arith.addf %86, %87 : vector<8x8xf32>
    %cst_25 = arith.constant dense<0xFF800000> : vector<8xf32>
    %89 = vector.multi_reduction <maximumf>, %88, %cst_25 [1] : vector<8x8xf32> to vector<8xf32>
    %90 = vector.shape_cast %89 : vector<8xf32> to vector<8x1xf32>
    %91 = vector.broadcast %90 : vector<8x1xf32> to vector<8x8xf32>
    %92 = arith.subf %88, %91 : vector<8x8xf32>
    %93 = math.exp %92 : vector<8x8xf32>
    %cst_26 = arith.constant dense<0.000000e+00> : vector<8xf32>
    %94 = vector.multi_reduction <add>, %93, %cst_26 [1] : vector<8x8xf32> to vector<8xf32>
    %95 = vector.shape_cast %94 : vector<8xf32> to vector<8x1xf32>
    %96 = tpu.reciprocal %95 {approx = true} : vector<8x1xf32> -> vector<8x1xf32>
    %97 = vector.broadcast %96 : vector<8x1xf32> to vector<8x8xf32>
    %98 = arith.mulf %93, %97 : vector<8x8xf32>
    %99 = arith.truncf %98 : vector<8x8xf32> to vector<8x8xbf16>
    %cst_27 = arith.constant dense<0.000000e+00> : vector<8x8xf32>
    %100 = tpu.matmul %99, %83, %cst_27 {dimension_numbers = #tpu.dot_dimension_numbers<[1], [0], [0], [1], [0, 0, 1, 1], [], []>} : vector<8x8xbf16>, vector<8x8xbf16>, vector<8x8xf32> -> vector<8x8xf32>
    %101 = tpu.concatenate %31, %54, %77, %100 in 1 : vector<8x8xf32>, vector<8x8xf32>, vector<8x8xf32>, vector<8x8xf32> -> vector<8x32xf32>
    %102 = arith.truncf %101 : vector<8x32xf32> to vector<8x32xbf16>
    %c0_28 = arith.constant 0 : index
    %c0_29 = arith.constant 0 : index
    %103 = vector.load %arg5[%c0_28, %c0_29] : memref<32x32xbf16, #tpu.memory_space<vmem>>, vector<32x32xbf16>
    %cst_30 = arith.constant dense<0.000000e+00> : vector<8x32xf32>
    %104 = tpu.matmul %102, %103, %cst_30 {dimension_numbers = #tpu.dot_dimension_numbers<[1], [0], [0], [1], [0, 0, 1, 1], [], []>} : vector<8x32xbf16>, vector<32x32xbf16>, vector<8x32xf32> -> vector<8x32xf32>
    %c0_31 = arith.constant 0 : index
    %c0_32 = arith.constant 0 : index
    %105 = vector.load %arg6[%c0_31, %c0_32] : memref<1x32xf32, #tpu.memory_space<vmem>>, vector<1x32xf32>
    %106 = vector.broadcast %105 : vector<1x32xf32> to vector<8x32xf32>
    %107 = arith.addf %104, %106 : vector<8x32xf32>
    %108 = arith.addf %107, %1 : vector<8x32xf32>
    %c0_33 = arith.constant 0 : index
    %c0_34 = arith.constant 0 : index
    %109 = vector.load %arg7[%c0_33, %c0_34] : memref<1x32xf32, #tpu.memory_space<vmem>>, vector<1x32xf32>
    %c0_35 = arith.constant 0 : index
    %c0_36 = arith.constant 0 : index
    %110 = vector.load %arg8[%c0_35, %c0_36] : memref<1x32xf32, #tpu.memory_space<vmem>>, vector<1x32xf32>
    %cst_37 = arith.constant dense<0.000000e+00> : vector<8xf32>
    %111 = vector.multi_reduction <add>, %108, %cst_37 [1] : vector<8x32xf32> to vector<8xf32>
    %112 = vector.shape_cast %111 : vector<8xf32> to vector<8x1xf32>
    %cst_38 = arith.constant 3.200000e+01 : f32
    %113 = vector.broadcast %cst_38 : f32 to vector<8x1xf32>
    %114 = arith.divf %112, %113 : vector<8x1xf32>
    %115 = vector.broadcast %114 : vector<8x1xf32> to vector<8x32xf32>
    %116 = arith.subf %108, %115 : vector<8x32xf32>
    %117 = arith.mulf %116, %116 : vector<8x32xf32>
    %cst_39 = arith.constant dense<0.000000e+00> : vector<8xf32>
    %118 = vector.multi_reduction <add>, %117, %cst_39 [1] : vector<8x32xf32> to vector<8xf32>
    %119 = vector.shape_cast %118 : vector<8xf32> to vector<8x1xf32>
    %cst_40 = arith.constant 3.200000e+01 : f32
    %120 = vector.broadcast %cst_40 : f32 to vector<8x1xf32>
    %121 = arith.divf %119, %120 : vector<8x1xf32>
    %cst_41 = arith.constant 9.99999996E-13 : f32
    %122 = vector.broadcast %cst_41 : f32 to vector<8x1xf32>
    %123 = arith.addf %121, %122 : vector<8x1xf32>
    %124 = math.rsqrt %123 : vector<8x1xf32>
    %125 = vector.broadcast %124 : vector<8x1xf32> to vector<8x32xf32>
    %126 = arith.mulf %116, %125 : vector<8x32xf32>
    %127 = vector.broadcast %109 : vector<1x32xf32> to vector<8x32xf32>
    %128 = arith.mulf %126, %127 : vector<8x32xf32>
    %129 = vector.broadcast %110 : vector<1x32xf32> to vector<8x32xf32>
    %130 = arith.addf %128, %129 : vector<8x32xf32>
    %131 = arith.truncf %130 : vector<8x32xf32> to vector<8x32xbf16>
    %c0_42 = arith.constant 0 : index
    %c0_43 = arith.constant 0 : index
    %132 = vector.load %arg9[%c0_42, %c0_43] : memref<32x64xbf16, #tpu.memory_space<vmem>>, vector<32x64xbf16>
    %cst_44 = arith.constant dense<0.000000e+00> : vector<8x64xf32>
    %133 = tpu.matmul %131, %132, %cst_44 {dimension_numbers = #tpu.dot_dimension_numbers<[1], [0], [0], [1], [0, 0, 1, 1], [], []>} : vector<8x32xbf16>, vector<32x64xbf16>, vector<8x64xf32> -> vector<8x64xf32>
    %c0_45 = arith.constant 0 : index
    %c0_46 = arith.constant 0 : index
    %134 = vector.load %arg10[%c0_45, %c0_46] : memref<1x64xf32, #tpu.memory_space<vmem>>, vector<1x64xf32>
    %135 = vector.broadcast %134 : vector<1x64xf32> to vector<8x64xf32>
    %136 = arith.addf %133, %135 : vector<8x64xf32>
    %cst_47 = arith.constant 5.000000e-01 : f32
    %137 = vector.broadcast %cst_47 : f32 to vector<8x64xf32>
    %138 = arith.mulf %136, %137 : vector<8x64xf32>
    %cst_48 = arith.constant 0.707106769 : f32
    %139 = vector.broadcast %cst_48 : f32 to vector<8x64xf32>
    %140 = arith.mulf %136, %139 : vector<8x64xf32>
    %141 = math.absf %140 : vector<8x64xf32>
    %cst_49 = arith.constant 0.327591091 : f32
    %142 = vector.broadcast %cst_49 : f32 to vector<8x64xf32>
    %143 = arith.mulf %142, %141 : vector<8x64xf32>
    %cst_50 = arith.constant 1.000000e+00 : f32
    %144 = vector.broadcast %cst_50 : f32 to vector<8x64xf32>
    %145 = arith.addf %144, %143 : vector<8x64xf32>
    %cst_51 = arith.constant 1.000000e+00 : f32
    %146 = vector.broadcast %cst_51 : f32 to vector<8x64xf32>
    %147 = arith.divf %146, %145 : vector<8x64xf32>
    %cst_52 = arith.constant 1.06140542 : f32
    %148 = vector.broadcast %cst_52 : f32 to vector<8x64xf32>
    %149 = arith.mulf %148, %147 : vector<8x64xf32>
    %cst_53 = arith.constant -1.45315206 : f32
    %150 = vector.broadcast %cst_53 : f32 to vector<8x64xf32>
    %151 = arith.addf %149, %150 : vector<8x64xf32>
    %152 = arith.mulf %151, %147 : vector<8x64xf32>
    %cst_54 = arith.constant 1.42141378 : f32
    %153 = vector.broadcast %cst_54 : f32 to vector<8x64xf32>
    %154 = arith.addf %152, %153 : vector<8x64xf32>
    %155 = arith.mulf %154, %147 : vector<8x64xf32>
    %cst_55 = arith.constant -0.284496725 : f32
    %156 = vector.broadcast %cst_55 : f32 to vector<8x64xf32>
    %157 = arith.addf %155, %156 : vector<8x64xf32>
    %158 = arith.mulf %157, %147 : vector<8x64xf32>
    %cst_56 = arith.constant 0.254829586 : f32
    %159 = vector.broadcast %cst_56 : f32 to vector<8x64xf32>
    %160 = arith.addf %158, %159 : vector<8x64xf32>
    %161 = arith.mulf %160, %147 : vector<8x64xf32>
    %cst_57 = arith.constant 0.000000e+00 : f32
    %162 = vector.broadcast %cst_57 : f32 to vector<8x64xf32>
    %163 = arith.subf %162, %141 : vector<8x64xf32>
    %164 = arith.mulf %163, %141 : vector<8x64xf32>
    %165 = math.exp %164 : vector<8x64xf32>
    %166 = arith.mulf %161, %165 : vector<8x64xf32>
    %cst_58 = arith.constant 1.000000e+00 : f32
    %167 = vector.broadcast %cst_58 : f32 to vector<8x64xf32>
    %168 = arith.subf %167, %166 : vector<8x64xf32>
    %cst_59 = arith.constant 0.000000e+00 : f32
    %169 = vector.broadcast %cst_59 : f32 to vector<8x64xf32>
    %170 = arith.cmpf oge, %140, %169 : vector<8x64xf32>
    %cst_60 = arith.constant 0.000000e+00 : f32
    %171 = vector.broadcast %cst_60 : f32 to vector<8x64xf32>
    %172 = arith.subf %171, %168 : vector<8x64xf32>
    %173 = arith.select %170, %168, %172 : vector<8x64xi1>, vector<8x64xf32>
    %cst_61 = arith.constant 1.000000e+00 : f32
    %174 = vector.broadcast %cst_61 : f32 to vector<8x64xf32>
    %175 = arith.addf %174, %173 : vector<8x64xf32>
    %176 = arith.mulf %138, %175 : vector<8x64xf32>
    %177 = arith.truncf %176 : vector<8x64xf32> to vector<8x64xbf16>
    %c0_62 = arith.constant 0 : index
    %c0_63 = arith.constant 0 : index
    %178 = vector.load %arg11[%c0_62, %c0_63] : memref<64x32xbf16, #tpu.memory_space<vmem>>, vector<64x32xbf16>
    %cst_64 = arith.constant dense<0.000000e+00> : vector<8x32xf32>
    %179 = tpu.matmul %177, %178, %cst_64 {dimension_numbers = #tpu.dot_dimension_numbers<[1], [0], [0], [1], [0, 0, 1, 1], [], []>} : vector<8x64xbf16>, vector<64x32xbf16>, vector<8x32xf32> -> vector<8x32xf32>
    %c0_65 = arith.constant 0 : index
    %c0_66 = arith.constant 0 : index
    %180 = vector.load %arg12[%c0_65, %c0_66] : memref<1x32xf32, #tpu.memory_space<vmem>>, vector<1x32xf32>
    %181 = vector.broadcast %180 : vector<1x32xf32> to vector<8x32xf32>
    %182 = arith.addf %179, %181 : vector<8x32xf32>
    %183 = arith.addf %182, %130 : vector<8x32xf32>
    %c0_67 = arith.constant 0 : index
    %c0_68 = arith.constant 0 : index
    %184 = vector.load %arg13[%c0_67, %c0_68] : memref<1x32xf32, #tpu.memory_space<vmem>>, vector<1x32xf32>
    %c0_69 = arith.constant 0 : index
    %c0_70 = arith.constant 0 : index
    %185 = vector.load %arg14[%c0_69, %c0_70] : memref<1x32xf32, #tpu.memory_space<vmem>>, vector<1x32xf32>
    %cst_71 = arith.constant dense<0.000000e+00> : vector<8xf32>
    %186 = vector.multi_reduction <add>, %183, %cst_71 [1] : vector<8x32xf32> to vector<8xf32>
    %187 = vector.shape_cast %186 : vector<8xf32> to vector<8x1xf32>
    %cst_72 = arith.constant 3.200000e+01 : f32
    %188 = vector.broadcast %cst_72 : f32 to vector<8x1xf32>
    %189 = arith.divf %187, %188 : vector<8x1xf32>
    %190 = vector.broadcast %189 : vector<8x1xf32> to vector<8x32xf32>
    %191 = arith.subf %183, %190 : vector<8x32xf32>
    %192 = arith.mulf %191, %191 : vector<8x32xf32>
    %cst_73 = arith.constant dense<0.000000e+00> : vector<8xf32>
    %193 = vector.multi_reduction <add>, %192, %cst_73 [1] : vector<8x32xf32> to vector<8xf32>
    %194 = vector.shape_cast %193 : vector<8xf32> to vector<8x1xf32>
    %cst_74 = arith.constant 3.200000e+01 : f32
    %195 = vector.broadcast %cst_74 : f32 to vector<8x1xf32>
    %196 = arith.divf %194, %195 : vector<8x1xf32>
    %cst_75 = arith.constant 9.99999996E-13 : f32
    %197 = vector.broadcast %cst_75 : f32 to vector<8x1xf32>
    %198 = arith.addf %196, %197 : vector<8x1xf32>
    %199 = math.rsqrt %198 : vector<8x1xf32>
    %200 = vector.broadcast %199 : vector<8x1xf32> to vector<8x32xf32>
    %201 = arith.mulf %191, %200 : vector<8x32xf32>
    %202 = vector.broadcast %184 : vector<1x32xf32> to vector<8x32xf32>
    %203 = arith.mulf %201, %202 : vector<8x32xf32>
    %204 = vector.broadcast %185 : vector<1x32xf32> to vector<8x32xf32>
    %205 = arith.addf %203, %204 : vector<8x32xf32>
    %206 = arith.truncf %205 : vector<8x32xf32> to vector<8x32xbf16>
    %c0_76 = arith.constant 0 : index
    %c0_77 = arith.constant 0 : index
    %207 = vector.load %arg15[%c0_76, %c0_77] : memref<8x32xbf16, #tpu.memory_space<vmem>>, vector<8x32xbf16>
    tpu.vector_store %arg15[%c0_76, %c0_77], %206 {strides = array<i32>} : memref<8x32xbf16, #tpu.memory_space<vmem>>, vector<8x32xbf16>,
    return
  }
  func.func @transform_0(%arg0: i32) -> (i32, i32) {
    %c0_i32 = arith.constant 0 : i32
    %c0_i32_0 = arith.constant 0 : i32
    return %arg0, %c0_i32 : i32, i32
  }
  func.func @transform_1(%arg0: i32) -> (i32, i32, i32) {
    %c0_i32 = arith.constant 0 : i32
    %c0_i32_0 = arith.constant 0 : i32
    %c0_i32_1 = arith.constant 0 : i32
    return %arg0, %c0_i32, %c0_i32_0 : i32, i32, i32
  }
  func.func @transform_2(%arg0: i32) -> (i32, i32) {
    %c0_i32 = arith.constant 0 : i32
    %c0_i32_0 = arith.constant 0 : i32
    %c0_i32_1 = arith.constant 0 : i32
    return %c0_i32, %c0_i32_0 : i32, i32
  }
  func.func @transform_3(%arg0: i32) -> (i32, i32) {
    %c0_i32 = arith.constant 0 : i32
    %c0_i32_0 = arith.constant 0 : i32
    %c0_i32_1 = arith.constant 0 : i32
    return %c0_i32, %c0_i32_0 : i32, i32
  }
  func.func @transform_4(%arg0: i32) -> (i32, i32) {
    %c0_i32 = arith.constant 0 : i32
    %c0_i32_0 = arith.constant 0 : i32
    %c0_i32_1 = arith.constant 0 : i32
    return %c0_i32, %c0_i32_0 : i32, i32
  }
  func.func @transform_5(%arg0: i32) -> (i32, i32) {
    %c0_i32 = arith.constant 0 : i32
    %c0_i32_0 = arith.constant 0 : i32
    %c0_i32_1 = arith.constant 0 : i32
    return %c0_i32, %c0_i32_0 : i32, i32
  }
  func.func @transform_6(%arg0: i32) -> (i32, i32) {
    %c0_i32 = arith.constant 0 : i32
    %c0_i32_0 = arith.constant 0 : i32
    %c0_i32_1 = arith.constant 0 : i32
    return %c0_i32, %c0_i32_0 : i32, i32
  }
  func.func @transform_7(%arg0: i32) -> (i32, i32) {
    %c0_i32 = arith.constant 0 : i32
    %c0_i32_0 = arith.constant 0 : i32
    %c0_i32_1 = arith.constant 0 : i32
    return %c0_i32, %c0_i32_0 : i32, i32
  }
  func.func @transform_8(%arg0: i32) -> (i32, i32) {
    %c0_i32 = arith.constant 0 : i32
    %c0_i32_0 = arith.constant 0 : i32
    %c0_i32_1 = arith.constant 0 : i32
    return %c0_i32, %c0_i32_0 : i32, i32
  }
  func.func @transform_9(%arg0: i32) -> (i32, i32) {
    %c0_i32 = arith.constant 0 : i32
    %c0_i32_0 = arith.constant 0 : i32
    %c0_i32_1 = arith.constant 0 : i32
    return %c0_i32, %c0_i32_0 : i32, i32
  }
  func.func @transform_10(%arg0: i32) -> (i32, i32) {
    %c0_i32 = arith.constant 0 : i32
    %c0_i32_0 = arith.constant 0 : i32
    %c0_i32_1 = arith.constant 0 : i32
    return %c0_i32, %c0_i32_0 : i32, i32
  }
  func.func @transform_11(%arg0: i32) -> (i32, i32) {
    %c0_i32 = arith.constant 0 : i32
    %c0_i32_0 = arith.constant 0 : i32
    %c0_i32_1 = arith.constant 0 : i32
    return %c0_i32, %c0_i32_0 : i32, i32
  }
  func.func @transform_12(%arg0: i32) -> (i32, i32) {
    %c0_i32 = arith.constant 0 : i32
    %c0_i32_0 = arith.constant 0 : i32
    %c0_i32_1 = arith.constant 0 : i32
    return %c0_i32, %c0_i32_0 : i32, i32
  }
  func.func @transform_13(%arg0: i32) -> (i32, i32) {
    %c0_i32 = arith.constant 0 : i32
    %c0_i32_0 = arith.constant 0 : i32
    %c0_i32_1 = arith.constant 0 : i32
    return %c0_i32, %c0_i32_0 : i32, i32
  }
  func.func @transform_14(%arg0: i32) -> (i32, i32) {
    %c0_i32 = arith.constant 0 : i32
    %c0_i32_0 = arith.constant 0 : i32
    return %arg0, %c0_i32 : i32, i32
  }
}

</mosaic_0001>

<bundles_post_ra>
// kernel: bert_base_forward.4
= control target key start
LH: loop header
LB: loop body
LE: loop exit
PB: predicated region body
PF: predicated region fallthrough
CT: control target
= control target key end

     0   :  { %vm18_vm0 = vcmask 261120   ;;  %vm70_vm1 = vcmask 257024   ;;  %s129_s0 = inlined_call_operand.vmem [shape: f32[16,32], index: 0, kind: input, shape index: {}]   ;;  %s130_s1 = inlined_call_operand.vmem [shape: f32[1,32], index: 1, kind: input, shape index: {}]   ;;  %s131_s2 = inlined_call_operand.vmem [shape: f32[1,32], index: 2, kind: input, shape index: {}]   ;;  %s132_s3 = inlined_call_operand.vmem [shape: bf16[16,32], index: 3, kind: output, shape index: {}]  }
   0x1   :  { %v14_v0 = vld [vmem:[%s129_s0] sm:$0xff]  ;;  %v15_v1 = vld [vmem:[%s129_s0 + $0x8] sm:$0xff] }
   0x2   :  { %v19_v2 = vsel %vm18_vm0, %v14_v0, 0.0  ;;  %v22_v3 = vsel %vm18_vm0, %v15_v1, 0.0  ;;  %v77_v21 = vld [vmem:[%s130_s1] ss:$0 sm:$0xff] }
   0x3   :  { %20 = vadd.xlane.f32.xlu0 %v19_v2  ;;  %v78_v23 = vld [vmem:[%s131_s2] ss:$0 sm:$0xff] }
   0x7   :  { %23 = vadd.xlane.f32.xlu0 %v22_v3 }
  0x90   :  { %v21_v4 = vpop.xlane.xlu0 %20 }
  0x91   :  { %v26_v5 = vmul.f32 0.03125, %v21_v4 }
  0x93   :  { %v28_v6 = vsub.f32 %v14_v0, %v26_v5 }
  0x94   :  { %v24_v7 = vpop.xlane.xlu0 %23 }
  0x95   :  { %v27_v8 = vmul.f32 0.03125, %v24_v7  ;;  %v30_v9 = vmul.f32 %v28_v6, %v28_v6 }
  0x97   :  { %v29_v10 = vsub.f32 %v15_v1, %v27_v8  ;;  %v32_v11 = vsel %vm18_vm0, %v30_v9, 0.0 }
  0x98   :  { %33 = vadd.xlane.f32.xlu1 %v32_v11 }
  0x99   :  { %v31_v12 = vmul.f32 %v29_v10, %v29_v10 }
  0x9b   :  { %v35_v13 = vsel %vm18_vm0, %v31_v12, 0.0 }
  0x9c   :  { %36 = vadd.xlane.f32.xlu1 %v35_v13 }
 0x125   :  { %v34_v14 = vpop.xlane.xlu1 %33 }
 0x126   :  { %v38_v15 = vmul.f32 0.03125, %v34_v14 }
 0x128   :  { %v40_v16 = vadd.f32 1e-12, %v38_v15 }
 0x129   :  { %v37_v17 = vpop.xlane.xlu1 %36 }
 0x12a   :  { %83 = vrsqrt.f32 %v40_v16  ;;  %v39_v18 = vmul.f32 0.03125, %v37_v17 }
 0x12c   :  { %v41_v19 = vadd.f32 1e-12, %v39_v18 }
 0x12e   :  { %85 = vrsqrt.f32 %v41_v19 }
 0x134   :  { %v84_v20 = vpop.eup %83 }
 0x135   :  { %v44_v22 = vmul.f32 %v84_v20, %v28_v6 }
 0x137   :  { %v52_v24 = vmul.f32 %v77_v21, %v44_v22 }
 0x138   :  { %v86_v25 = vpop.eup %85 }
 0x139   :  { %v60_v26 = vadd.f32 %v78_v23, %v52_v24  ;;  %v45_v27 = vmul.f32 %v86_v25, %v29_v10 }
 0x13b   :  { %v81_v28 = vpack.c.bf16 %v60_v26, %v60_v26  ;;  %v53_v29 = vmul.f32 %v77_v21, %v45_v27 }
 0x13d   :  { %71 = vst.msk [vmem:[%s132_s3] sm:$0xf] %vm70_vm1, %v81_v28  ;;  %v61_v30 = vadd.f32 %v78_v23, %v53_v29 }
 0x13f   :  { %v82_v31 = vpack.c.bf16 %v61_v30, %v61_v30 }
 0x141   :  { %72 = vst.msk [vmem:[%s132_s3 + $0x4] sm:$0xf] %vm70_vm1, %v82_v31 }

// kernel: bert_base_forward.7
= control target key start
LH: loop header
LB: loop body
LE: loop exit
PB: predicated region body
PF: predicated region fallthrough
CT: control target
= control target key end

     0   :  { %v252_v1 = vmov 0.0   ;;  %vm253_vm0 = vmmov 0   ;;  %s323_s0 = inlined_call_operand.vmem [shape: bf16[2,32], index: 0, kind: input, shape index: {}]   ;;  %s324_s1 = inlined_call_operand.vmem [shape: bf16[32,32], index: 1, kind: input, shape index: {}]   ;;  %s325_s2 = inlined_call_operand.vmem [shape: f32[1,32], index: 2, kind: input, shape index: {}]   ;;  %s326_s3 = inlined_call_operand.vmem [shape: bf16[32,4], index: 3, kind: input, shape index: {}]   ;;  %s327_s4 = inlined_call_operand.vmem [shape: f32[1,4], index: 4, kind: input, shape index: {}]   ;;  %s328_s5 = inlined_call_operand.hbm [shape: f32[2,4], index: 5, kind: output, shape index: {}]  }
   0x1   :  { %v218_v0 = vld [vmem:[%s324_s1] sm:$0xff]   ;;  %199 = vmatprep.subr.bf16.mxu0 %v252_v1  ;;  %207 = vmatprep.subr.bf16.mxu1 %v252_v1  ;;  %v219_v2 = vld [vmem:[%s324_s1 + $0x8] sm:$0xff]  }
   0x2   :  { %200 = vmatpush3.bf16.msra.mxu0 %v218_v0  ;;  %203 = vmatprep.mubr.msk.bf16.mxu0 %vm253_vm0, %v252_v1 }
   0x3   :  { %201 = vmatprep.subr.bf16.mxu0 %v252_v1  ;;  %211 = vmatprep.mubr.msk.bf16.mxu1 %vm253_vm0, %v252_v1 }
   0x4   :  { %10 = vsyncpa [#allocation3], 0  ;;  %v22_v3 = vld [vmem:[%s323_s0] sm:$0x1]  ;;  %vm46_vm1 = vcmask 261120   ;;  %v221_v5 = vld [vmem:[%s326_s3 + $0x8] sm:$0xff]  }
   0x5   :  { %v220_v4 = vld [vmem:[%s326_s3] sm:$0xff]   ;;  %vm158_vm2 = vcmask 25600  }
   0x6   :  { %202 = vmatpush3.bf16.msra.mxu0 %v219_v2  ;;  %208 = vmatpush3.bf16.msra.mxu1 %v220_v4  ;;  %v185_v6 = vld [vmem:[%s325_s2] ss:$0 sm:$0xff]  ;;  %s254_s2 = smov [#allocation2]  }
   0x7   :  { %209 = vmatprep.subr.bf16.mxu1 %v252_v1  ;;  %v189_v14 = vld [vmem:[%s327_s4] ss:$0 sm:$0xff]  ;;  %s177_s3 = sshll.u32 %s254_s2, 4  ;;  %s178_s3 = int_to_ptr.vmem [resolvable:$true] %s177_s3 }
   0x8   :  { %s228_s4 = scalar_lea.vmem %s178_s3, 32  ;;  %p233_p1 = scmp.lt.s32.totalorder %s178_s3, %s178_s3 }
   0x9   :  { %204 = vmatmul.mubr.msk.bf16.vlgmr.msra.gmra.mrb[0].mxu0 %vm46_vm1, %v22_v3  ;;  %p229_p0 = scmp.ne.s32.totalorder %s178_s3, %s228_s4  ;;  %p234_p2 = scmp.lt.s32.totalorder %s228_s4, %s228_s4 }
   0xa   :  { %210 = vmatpush3.bf16.msra.mxu1 %v221_v5 }
   0xb   :  { %p235_p3 = por %p234_p2, %p233_p1 }
   0xd   :  { %p236_p4 = pnand %p235_p3, %p229_p0 }
  0xdc   :  { %v84_v7 = vpop.f32.mrb[0].mxu0 }
  0xdd   :  { %v85_v8 = vadd.f32 %v185_v6, %v84_v7  ;;  %v205_v9 = vpop.f32.mrb[1].mxu0 }
  0xde   :  { %v87_v10 = vpop.f32.mrb[2].mxu0 }
  0xdf   :  { %222 = vtanh.f32 %v85_v8  ;;  %v206_v11 = vpop.f32.mrb[3].mxu0 }
  0xe9   :  { %v223_v12 = vpop.eup %222 }
  0xea   :  { %v91_v13 = vpack.c.bf16 %v223_v12, %v223_v12 }
  0xec   :  { %212 = vmatmul.mubr.msk.bf16.vlgmr.msra.gmra.mrb[0].mxu1 %vm46_vm1, %v91_v13 }
 0x1bf   :  { %v152_v15 = vpop.f32.mrb[0].mxu1 }
 0x1c0   :  { %v153_v16 = vadd.f32 %v189_v14, %v152_v15  ;;  %v213_v17 = vpop.f32.mrb[1].mxu1 }
 0x1c1   :  { %v155_v18 = vpop.f32.mrb[2].mxu1 }
 0x1c2   :  { %v214_v19 = vpop.f32.mrb[3].mxu1  ;;  %v159_v20 = vsel %vm158_vm2, %v153_v16, -inf }
 0x1c3   :  { %160 = vmax.xlane.f32.xlu0 %v159_v20 }
 0x250   :  { %v161_v21 = vpop.xlane.xlu0 %160 }
 0x251   :  { %v162_v22 = vsub.f32 %v153_v16, %v161_v21 }
 0x253   :  { %v163_v23 = vmul.f32 1.442695, %v162_v22 }
 0x255   :  { %224 = vpow2.f32 %v163_v23 }
 0x25f   :  { %v225_v24 = vpop.eup %224 }
 0x260   :  { %v165_v25 = vsel %vm158_vm2, %v225_v24, 0.0 }
 0x261   :  { %166 = vadd.xlane.f32.xlu0 %v165_v25 }
 0x2ee   :  { %v167_v26 = vpop.xlane.xlu0 %166 }
 0x2ef   :  { %226 = vrcp.f32 %v167_v26 }
 0x2f9   :  { %v227_v27 = vpop.eup %226 }
 0x2fa   :  { %v169_v28 = vmul.f32 %v227_v27, %v225_v24 }
 0x2fc   :  { %170 = vst.msk [vmem:[#allocation2] sm:$0x3] %vm158_vm2, %v169_v28 }
 0x2fd   :  { %239 = shalt.err (!%p236_p4)
}
 0x2fe   :  { %s240_s7 = scalar_lea.hbm %s328_s5, 32 }
 0x2ff   :  { %p241_p5 = scmp.ne.s32.totalorder %s328_s5, %s240_s7  ;;  %p244_p6 = scmp.lt.u32.totalorder %s240_s7, %s328_s5 }
 0x301   :  { %p246_p7 = pnand %p244_p6, %p241_p5 }
 0x303   :  { %249 = shalt.err (!%p246_p7)
}
 0x304   :  { %180 = dma.vmem_to_hbm [thread:$0]  %s178_s3, 32, %s328_s5, [#allocation3]  }
 0x305   :  { %250 = dma.done.wait [#allocation3], 32  }
 0x306   :  { %251 = vsyncadd [#allocation3], 4294967264 }
 0x307   :  { %184 = vsyncpa [#allocation3], 1 }

// kernel: bert_base_forward.5
= control target key start
LH: loop header
LB: loop body
LE: loop exit
PB: predicated region body
PF: predicated region fallthrough
CT: control target
= control target key end

     0   :  { %s1703_s29 = smov 0   ;;  %s1877_s0 = inlined_call_operand.vmem [shape: bf16[16,32], index: 0, kind: input, shape index: {}]   ;;  %s1878_s1 = inlined_call_operand.vmem [shape: f32[2,1,8], index: 1, kind: input, shape index: {}]   ;;  %s1879_s2 = inlined_call_operand.vmem [shape: bf16[32,96], index: 2, kind: input, shape index: {}]   ;;  %s1880_s3 = inlined_call_operand.vmem [shape: f32[1,96], index: 3, kind: input, shape index: {}]   ;;  %s1881_s4 = inlined_call_operand.vmem [shape: bf16[32,32], index: 4, kind: input, shape index: {}]   ;;  %s1882_s5 = inlined_call_operand.vmem [shape: f32[1,32], index: 5, kind: input, shape index: {}]   ;;  %s1883_s6 = inlined_call_operand.vmem [shape: f32[1,32], index: 6, kind: input, shape index: {}]   ;;  %s1884_s7 = inlined_call_operand.vmem [shape: f32[1,32], index: 7, kind: input, shape index: {}]   ;;  %s1885_s8 = inlined_call_operand.vmem [shape: bf16[32,64], index: 8, kind: input, shape index: {}]   ;;  %s1886_s9 = inlined_call_operand.vmem [shape: f32[1,64], index: 9, kind: input, shape index: {}]   ;;  %s1887_s10 = inlined_call_operand.vmem [shape: bf16[64,32], index: 10, kind: input, shape index: {}]   ;;  %s1888_s11 = inlined_call_operand.vmem [shape: f32[1,32], index: 11, kind: input, shape index: {}]   ;;  %s1889_s12 = inlined_call_operand.vmem [shape: f32[1,32], index: 12, kind: input, shape index: {}]   ;;  %s1890_s13 = inlined_call_operand.vmem [shape: f32[1,32], index: 13, kind: input, shape index: {}]   ;;  %s1891_s14 = inlined_call_operand.vmem [shape: bf16[16,32], index: 14, kind: output, shape index: {}]  }
   0x1 LB: > { %s1392_s30 = sadd.s32 4294967295, %s1610_s29   ;;  %p1396_p0 = scmp.ge.s32.totalorder %s1610_s29, 1  ;;  %s1610_s29 = sphi %s1703_s29, %s24_s29  }
   0x2   : > { %p419_p1 = scmp.lt.s32.totalorder %s1610_s29, 3 }
   0x4   : > { %p420_p2 = pnand %p1396_p0, %p419_p1 }
   0x5   : > { %v1570_v0 = vld [vmem:[%s1879_s2] sm:$0xff] (!%p420_p2)   ;;  %v1612_v1 = vmov (!%p420_p2), 0.0   ;;  %v1571_v2 = vld [vmem:[%s1879_s2 + $0x8] sm:$0xff] (!%p420_p2)   ;;  %vm1613_vm0 = vmmov (!%p420_p2), 0   ;;  %p466_p3 = scmp.lt.s32.totalorder (!%p420_p2), %s1392_s30, 1  ;;  %vm504_vm1 = vcmask (!%p420_p2), 261120  }
   0x6   : > { %423 = sbr.rel (%p420_p2) target bundleno = 2607 (0xa2f), region = 76  ;;  %1462 = vmatprep.subr.bf16.mxu0 (!%p420_p2), %v1612_v1  ;;  %1470 = vmatprep.subr.bf16.mxu1 (!%p420_p2), %v1612_v1  ;;  %v1399_v4 = vld [vmem:[%s1880_s3] ss:$0 sm:$0xff] (!%p420_p2)  ;;  %s1614_s25 = smov (!%p420_p2), 120   ;;  %vm552_vm2 = vcmask (!%p420_p2), 64512   ;;  %vm624_vm3 = vcmask (!%p420_p2), 1043456  }
   0x7   : > { %1463 = vmatpush3.bf16.msra.mxu0 (!%p420_p2), %v1570_v0  ;;  %1466 = vmatprep.mubr.msk.bf16.mxu0 (!%p420_p2), %vm1613_vm0, %v1612_v1  ;;  %s1615_s26 = smov (!%p420_p2), 96   ;;  %s1616_s27 = smov (!%p420_p2), 80   ;;  %vm1017_vm4 = vcmask (!%p420_p2), 130048   ;;  %vm1019_vm5 = vcmask (!%p420_p2), 195584   ;;  %vm1253_vm7 = vcmask (!%p420_p2), 523264   ;;  %vm1328_vm8 = vcmask (!%p420_p2), 257024  }
   0x8   : > { %1464 = vmatprep.subr.bf16.mxu0 (!%p420_p2), %v1612_v1  ;;  %1472 = vmatprep.mubr.msk.bf16.mxu1 (!%p420_p2), %vm1613_vm0, %v1612_v1  ;;  %s1617_s28 = smov (!%p420_p2), 88   ;;  %s1618_s15 = smov (!%p420_p2), 72  }
   0x9   : > { %s1619_s16 = smov (!%p420_p2), 112   ;;  %s1620_s17 = smov (!%p420_p2), 104  }
   0xa   : > { %s1622_s23 = smov (!%p420_p2), 64   ;;  %s1623_s24 = smov (!%p420_p2), 40  }
   0xb   : > { %1465 = vmatpush3.bf16.msra.mxu0 (!%p420_p2), %v1571_v2  ;;  %s1627_s18 = smov (!%p420_p2), 24  }
   0xc   : > { %1476 = vmatprep.subr.bf16.mxu0 (!%p420_p2), %v1612_v1 }
   0xd   : > { %s1893_s30 = smov (!%p466_p3, %s1392_s30), 1 }
   0xe   : > { %s1397_s19 = sshll.u32 %s1893_s30, 2  ;;  %s472_s21 = scalar_lea.vmem %s1878_s1, %s1893_s30 }
   0xf   : > { %s469_s22 = scalar_lea.vmem %s1877_s0, %s1397_s19  ;;  %v1404_v23 = vld [vmem:[%s472_s21] ss:$0 sm:$0xff] }
  0x10   : > { %v1733_v3 = vld [vmem:[%s469_s22] sm:$0xf]  ;;  %s1621_s22 = smov 56  }
  0x11   : > { %1467 = vmatmul.mubr.msk.bf16.vlgmr.msra.gmra.mrb[0].mxu0 %vm504_vm1, %v1733_v3 }
  0x12   : > { %1478 = vmatprep.mubr.msk.bf16.mxu0 %vm1613_vm0, %v1612_v1 }
  0xe4   : > { %v542_v5 = vpop.f32.mrb[0].mxu0 }
  0xe5   : > { %v543_v6 = vadd.f32 %v1399_v4, %v542_v5  ;;  %v1468_v7 = vpop.f32.mrb[1].mxu0 }
  0xe6   : > { %v545_v8 = vpop.f32.mrb[2].mxu0 }
  0xe7   : > { %v1742_v9 = vpack.c.bf16 %v543_v6, %v543_v6  ;;  %v1469_v10 = vpop.f32.mrb[3].mxu0 }
  0xe9   : > { %668 = vrot.lane.b32.xlu1 %v1742_v9, %s1614_s25  ;;  %550 = vrot.lane.b32.xlu0 %v1742_v9, %s1615_s26  ;;  %s1624_s25 = smov 48   ;;  %s1625_s26 = smov 8  }
  0xed   : > { %782 = vrot.lane.b32.xlu1 %v1742_v9, %s1616_s27  ;;  %670 = vrot.lane.b32.xlu0 %v1742_v9, %s1617_s28 }
  0xf1   : > { %894 = vrot.lane.b32.xlu1 %v1742_v9, %s1618_s15  ;;  %780 = vrot.lane.b32.xlu0 %v1742_v9, %s1619_s16 }
  0xf5   : > { %892 = vrot.lane.b32.xlu0 %v1742_v9, %s1620_s17  ;;  %s1626_s17 = smov 16  }
 0x15b   : > { %v551_v11 = vpop.permute.xlu0 %550  ;;  %v669_v14 = vpop.permute.xlu1 %668 }
 0x15c   : > { %v557_v12 = vsel %vm552_vm2, %v551_v11, 0 }
 0x15d   : > { %1471 = vmatpush3.bf16.xpose.msra.mxu1 %v557_v12 }
 0x15e   : > { %1482 = vmatprep.subr.bf16.mxu1 %v1612_v1 }
 0x15f   : > { %v671_v13 = vpop.permute.xlu0 %670  ;;  %v783_v16 = vpop.permute.xlu1 %782 }
 0x160   : > { %v676_v15 = vsel %vm552_vm2, %v671_v13, 0  ;;  %v788_v17 = vsel %vm552_vm2, %v783_v16, 0 }
 0x163   : > { %v895_v18 = vpop.permute.xlu1 %894  ;;  %v781_v19 = vpop.permute.xlu0 %780 }
 0x164   : > { %1473 = vmatmul.mubr.msk.bf16.vlgmr.msra.gmra.mrb[0].mxu1 %vm552_vm2, %v1742_v9  ;;  %v900_v20 = vsel %vm552_vm2, %v895_v18, 0 }
 0x165   : > { %1483 = vmatpush3.bf16.xpose.msra.mxu1 %v676_v15  ;;  %1484 = vmatprep.mubr.msk.bf16.mxu1 %vm1613_vm0, %v1612_v1 }
 0x166   : > { %1494 = vmatprep.subr.bf16.mxu1 %v1612_v1 }
 0x167   : > { %v893_v21 = vpop.permute.xlu0 %892 }
 0x16c   : > { %1485 = vmatmul.mubr.msk.bf16.vlgmr.msra.gmra.mrb[4].mxu1 %vm552_vm2, %v669_v14 }
 0x16d   : > { %1495 = vmatpush3.bf16.xpose.msra.mxu1 %v788_v17  ;;  %1496 = vmatprep.mubr.msk.bf16.mxu1 %vm1613_vm0, %v1612_v1 }
 0x16e   : > { %1506 = vmatprep.subr.bf16.mxu1 %v1612_v1 }
 0x174   : > { %1497 = vmatmul.mubr.msk.bf16.vlgmr.msra.gmra.mrb[8].mxu1 %vm552_vm2, %v781_v19 }
 0x175   : > { %1507 = vmatpush3.bf16.xpose.msra.mxu1 %v900_v20  ;;  %1508 = vmatprep.mubr.msk.bf16.mxu1 %vm1613_vm0, %v1612_v1 }
 0x176   : > { %1518 = vmatprep.subr.bf16.mxu1 %v1612_v1 }
 0x17c   : > { %1509 = vmatmul.mubr.msk.bf16.vlgmr.msra.gmra.mrb[12].mxu1 %vm552_vm2, %v893_v21 }
 0x17d   : > { %1522 = vmatprep.mubr.msk.bf16.mxu1 %vm1613_vm0, %v1612_v1 }
 0x237   : > { %v593_v22 = vpop.f32.mrb[0].mxu1 }
 0x238   : > { %v599_v24 = vmul.f32 0.35355338, %v593_v22  ;;  %v1474_v25 = vpop.f32.mrb[1].mxu1 }
 0x239   : > { %v596_v26 = vpop.f32.mrb[2].mxu1 }
 0x23a   : > { %v1475_v27 = vpop.f32.mrb[3].mxu1  ;;  %v606_v28 = vadd.f32 %v1404_v23, %v599_v24 }
 0x23c   : > { %v607_v29 = vsel %vm552_vm2, %v606_v28, -inf }
 0x23d   : > { %608 = vmax.xlane.f32.xlu1 %v607_v29 }
 0x23f   : > { %v712_v30 = vpop.f32.mrb[4].mxu1 }
 0x240   : > { %v718_v31 = vmul.f32 0.35355338, %v712_v30  ;;  %v1486_v32 = vpop.f32.mrb[5].mxu1 }
 0x241   : > { %v715_v33 = vpop.f32.mrb[6].mxu1 }
 0x242   : > { %v1487_v34 = vpop.f32.mrb[7].mxu1  ;;  %v719_v35 = vadd.f32 %v1404_v23, %v718_v31 }
 0x244   : > { %v720_v36 = vsel %vm552_vm2, %v719_v35, -inf }
 0x245   : > { %721 = vmax.xlane.f32.xlu0 %v720_v36 }
 0x247   : > { %v824_v37 = vpop.f32.mrb[8].mxu1 }
 0x248   : > { %v830_v38 = vmul.f32 0.35355338, %v824_v37  ;;  %v1498_v39 = vpop.f32.mrb[9].mxu1 }
 0x249   : > { %v827_v40 = vpop.f32.mrb[10].mxu1 }
 0x24a   : > { %v1499_v41 = vpop.f32.mrb[11].mxu1  ;;  %v831_v42 = vadd.f32 %v1404_v23, %v830_v38 }
 0x24b   : > { %v1572_v41 = vld [vmem:[%s1881_s4] sm:$0xff]  }
 0x24c   : > { %v832_v43 = vsel %vm552_vm2, %v831_v42, -inf  ;;  %1519 = vmatpush3.bf16.msra.mxu1 %v1572_v41 }
 0x24d   : > { %833 = vmax.xlane.f32.xlu0 %v832_v43  ;;  %1520 = vmatprep.subr.bf16.mxu1 %v1612_v1 }
 0x24f   : > { %v936_v44 = vpop.f32.mrb[12].mxu1 }
 0x250   : > { %v942_v45 = vmul.f32 0.35355338, %v936_v44  ;;  %v1510_v46 = vpop.f32.mrb[13].mxu1 }
 0x251   : > { %v939_v47 = vpop.f32.mrb[14].mxu1 }
 0x252   : > { %v1511_v48 = vpop.f32.mrb[15].mxu1  ;;  %v943_v49 = vadd.f32 %v1404_v23, %v942_v45 }
 0x254   : > { %v944_v50 = vsel %vm552_vm2, %v943_v49, -inf }
 0x255   : > { %945 = vmax.xlane.f32.xlu1 %v944_v50 }
 0x2ca   : > { %v609_v51 = vpop.xlane.xlu1 %608 }
 0x2cb   : > { %v610_v52 = vsub.f32 %v606_v28, %v609_v51 }
 0x2cd   : > { %v611_v53 = vmul.f32 1.442695, %v610_v52 }
 0x2cf   : > { %1580 = vpow2.f32 %v611_v53 }
 0x2d2   : > { %v722_v54 = vpop.xlane.xlu0 %721 }
 0x2d3   : > { %v723_v55 = vsub.f32 %v719_v35, %v722_v54 }
 0x2d5   : > { %v724_v56 = vmul.f32 1.442695, %v723_v55 }
 0x2d7   : > { %1582 = vpow2.f32 %v724_v56 }
 0x2d9   : > { %v1581_v57 = vpop.eup %1580 }
 0x2da   : > { %v834_v58 = vpop.xlane.xlu0 %833  ;;  %v613_v59 = vsel %vm552_vm2, %v1581_v57, 0.0 }
 0x2db   : > { %v835_v60 = vsub.f32 %v831_v42, %v834_v58  ;;  %614 = vadd.xlane.f32.xlu0 %v613_v59  ;;  %v1573_v42 = vld [vmem:[%s1881_s4 + $0x8] sm:$0xff]   ;;  %v1412_v58 = vld [vmem:[%s1882_s5] ss:$0 sm:$0xff]  ;;  %v479_v59 = vunpack.c.l.bf16 %v1733_v3 }
 0x2dc   : > { %1521 = vmatpush3.bf16.msra.mxu1 %v1573_v42  ;;  %v1574_v3 = vld [vmem:[%s1885_s8] sm:$0xff]  }
 0x2dd   : > { %v836_v61 = vmul.f32 1.442695, %v835_v60  ;;  %1534 = vmatprep.subr.bf16.mxu1 %v1612_v1 }
 0x2df   : > { %1584 = vpow2.f32 %v836_v61 }
 0x2e1   : > { %v1583_v62 = vpop.eup %1582 }
 0x2e2   : > { %v726_v63 = vsel %vm552_vm2, %v1583_v62, 0.0  ;;  %v946_v4 = vpop.xlane.xlu1 %945 }
 0x2e3   : > { %727 = vadd.xlane.f32.xlu1 %v726_v63  ;;  %v947_v5 = vsub.f32 %v943_v49, %v946_v4 }
 0x2e5   : > { %v948_v6 = vmul.f32 1.442695, %v947_v5 }
 0x2e7   : > { %1586 = vpow2.f32 %v948_v6 }
 0x2e9   : > { %v1585_v0 = vpop.eup %1584 }
 0x2ea   : > { %v838_v2 = vsel %vm552_vm2, %v1585_v0, 0.0 }
 0x2eb   : > { %839 = vadd.xlane.f32.xlu0 %v838_v2 }
 0x2f1   : > { %v1587_v7 = vpop.eup %1586 }
 0x2f2   : > { %v950_v8 = vsel %vm552_vm2, %v1587_v7, 0.0 }
 0x2f4   : > { %732 = vrot.lane.b32.xlu1 %v1742_v9, %s1621_s22  ;;  %s476_s22 = scalar_lea.vmem %s1891_s14, %s1397_s19 }
 0x301   : > { %619 = vrot.lane.b32.xlu0 %v1742_v9, %s1622_s23 }
 0x305   : > { %956 = vrot.lane.b32.xlu0 %v1742_v9, %s1623_s24 }
 0x318   : > { %951 = vadd.xlane.f32.xlu1 %v950_v8 }
 0x329   : > { %844 = vrot.lane.b32.xlu1 %v1742_v9, %s1624_s25 }
 0x368   : > { %v615_v10 = vpop.xlane.xlu0 %614 }
 0x369   : > { %1588 = vrcp.f32 %v615_v10 }
 0x370   : > { %v728_v11 = vpop.xlane.xlu1 %727 }
 0x371   : > { %1590 = vrcp.f32 %v728_v11  ;;  %v1575_v11 = vld [vmem:[%s1885_s8 + $0x8] sm:$0xff]  }
 0x373   : > { %v1589_v12 = vpop.eup %1588 }
 0x374   : > { %v617_v14 = vmul.f32 %v1589_v12, %v1581_v57  ;;  %v733_v17 = vpop.permute.xlu1 %732 }
 0x375   : > { %v738_v20 = vsel %vm624_vm3, %v733_v17, 0 }
 0x376   : > { %v618_v18 = vpack.c.bf16 %v617_v14, %v617_v14 }
 0x378   : > { %v840_v13 = vpop.xlane.xlu0 %839 }
 0x379   : > { %1592 = vrcp.f32 %v840_v13 }
 0x37b   : > { %v1591_v19 = vpop.eup %1590 }
 0x37c   : > { %v620_v15 = vpop.permute.xlu0 %619  ;;  %v730_v9 = vmul.f32 %v1591_v19, %v1583_v62 }
 0x37d   : > { %v626_v16 = vsel %vm624_vm3, %v620_v15, 0 }
 0x37e   : > { %1477 = vmatpush3.bf16.msra.mxu0 %v626_v16  ;;  %v731_v21 = vpack.c.bf16 %v730_v9, %v730_v9  ;;  %v1416_v16 = vld [vmem:[%s1883_s6] ss:$0 sm:$0xff] }
 0x37f   : > { %1488 = vmatprep.subr.bf16.mxu0 %v1612_v1 }
 0x380   : > { %v957_v27 = vpop.permute.xlu0 %956 }
 0x381   : > { %1479 = vmatmul.mubr.msk.bf16.vlgmr.msra.gmra.mrb[4].mxu0 %vm552_vm2, %v618_v18  ;;  %v962_v29 = vsel %vm624_vm3, %v957_v27, 0  ;;  %v1417_v18 = vld [vmem:[%s1884_s7] ss:$0 sm:$0xff] }
 0x382   : > { %1489 = vmatpush3.bf16.msra.mxu0 %v738_v20  ;;  %1490 = vmatprep.mubr.msk.bf16.mxu0 %vm1613_vm0, %v1612_v1 }
 0x383   : > { %1500 = vmatprep.subr.bf16.mxu0 %v1612_v1  ;;  %v1593_v22 = vpop.eup %1592 }
 0x384   : > { %v842_v24 = vmul.f32 %v1593_v22, %v1585_v0  ;;  %v1577_v22 = vld [vmem:[%s1887_s10 + $0x8] sm:$0xff]  }
 0x386   : > { %v843_v28 = vpack.c.bf16 %v842_v24, %v842_v24  ;;  %v1579_v24 = vld [vmem:[%s1887_s10 + $0x18] sm:$0xff]  }
 0x389   : > { %1491 = vmatmul.mubr.msk.bf16.vlgmr.msra.gmra.mrb[8].mxu0 %vm552_vm2, %v731_v21  ;;  %v1576_v21 = vld [vmem:[%s1887_s10] sm:$0xff]  }
 0x38a   : > { %1502 = vmatprep.mubr.msk.bf16.mxu0 %vm1613_vm0, %v1612_v1 }
 0x3a5   : > { %v952_v23 = vpop.xlane.xlu1 %951 }
 0x3a6   : > { %1594 = vrcp.f32 %v952_v23  ;;  %v1578_v23 = vld [vmem:[%s1887_s10 + $0x10] sm:$0xff]  }
 0x3a9   : > { %v845_v25 = vpop.permute.xlu1 %844 }
 0x3aa   : > { %v850_v26 = vsel %vm624_vm3, %v845_v25, 0  ;;  %v1418_v25 = vld [vmem:[%s1886_s9] ss:$0 sm:$0xff] }
 0x3ab   : > { %1501 = vmatpush3.bf16.msra.mxu0 %v850_v26 }
 0x3ac   : > { %1512 = vmatprep.subr.bf16.mxu0 %v1612_v1 }
 0x3ae   : > { %1503 = vmatmul.mubr.msk.bf16.vlgmr.msra.gmra.mrb[12].mxu0 %vm552_vm2, %v843_v28 }
 0x3af   : > { %1513 = vmatpush3.bf16.msra.mxu0 %v962_v29  ;;  %1514 = vmatprep.mubr.msk.bf16.mxu0 %vm1613_vm0, %v1612_v1 }
 0x3b0   : > { %v1595_v30 = vpop.eup %1594  ;;  %1526 = vmatprep.subr.bf16.mxu0 %v1612_v1 }
 0x3b1   : > { %v954_v31 = vmul.f32 %v1595_v30, %v1587_v7 }
 0x3b3   : > { %v955_v32 = vpack.c.bf16 %v954_v31, %v954_v31 }
 0x3b6   : > { %1515 = vmatmul.mubr.msk.bf16.vlgmr.msra.gmra.mrb[16].mxu0 %vm552_vm2, %v955_v32 }
 0x3b7   : > { %1530 = vmatprep.mubr.msk.bf16.mxu0 %vm1613_vm0, %v1612_v1  ;;  %1527 = vmatpush3.bf16.msra.mxu0 %v1574_v3 }
 0x3b8   : > { %1528 = vmatprep.subr.bf16.mxu0 %v1612_v1 }
 0x3bb   : > { %1529 = vmatpush3.bf16.msra.mxu0 %v1575_v11  ;;  %v1428_v11 = vld [vmem:[%s1889_s12] ss:$0 sm:$0xff] }
 0x454   : > { %v662_v33 = vpop.f32.mrb[4].mxu0 }
 0x455   : > { %v1480_v34 = vpop.f32.mrb[5].mxu0 }
 0x456   : > { %v665_v35 = vpop.f32.mrb[6].mxu0 }
 0x457   : > { %v1481_v36 = vpop.f32.mrb[7].mxu0 }
 0x45c   : > { %v774_v37 = vpop.f32.mrb[8].mxu0 }
 0x45d   : > { %1005 = vrot.lane.b32.xlu1 %v774_v37, %s1625_s26  ;;  %v1492_v38 = vpop.f32.mrb[9].mxu0 }
 0x45e   : > { %v777_v39 = vpop.f32.mrb[10].mxu0 }
 0x45f   : > { %v1493_v40 = vpop.f32.mrb[11].mxu0 }
 0x481   : > { %v886_v43 = vpop.f32.mrb[12].mxu0 }
 0x482   : > { %1009 = vrot.lane.b32.xlu0 %v886_v43, %s1626_s17  ;;  %v1504_v44 = vpop.f32.mrb[13].mxu0 }
 0x483   : > { %v889_v45 = vpop.f32.mrb[14].mxu0 }
 0x484   : > { %v1505_v46 = vpop.f32.mrb[15].mxu0 }
 0x489   : > { %v998_v47 = vpop.f32.mrb[16].mxu0 }
 0x48a   : > { %1013 = vrot.lane.b32.xlu1 %v998_v47, %s1627_s18  ;;  %v1516_v48 = vpop.f32.mrb[17].mxu0 }
 0x48b   : > { %v1001_v49 = vpop.f32.mrb[18].mxu0 }
 0x48c   : > { %v1517_v50 = vpop.f32.mrb[19].mxu0 }
 0x4cf   : > { %v1006_v51 = vpop.permute.xlu1 %1005 }
 0x4d0   : > { %v1016_v53 = vsel %vm552_vm2, %v662_v33, %v1006_v51 }
 0x4f4   : > { %v1010_v52 = vpop.permute.xlu0 %1009 }
 0x4f5   : > { %v1018_v54 = vsel %vm1017_vm4, %v1016_v53, %v1010_v52 }
 0x4fc   : > { %v1014_v55 = vpop.permute.xlu1 %1013 }
 0x4fd   : > { %v1020_v56 = vsel %vm1019_vm5, %v1018_v54, %v1014_v55 }
 0x4fe   : > { %v1021_v57 = vpack.c.bf16 %v1020_v56, %v1020_v56  ;;  %v1422_v56 = vld [vmem:[%s1888_s11] ss:$0 sm:$0xff] }
 0x500   : > { %1523 = vmatmul.mubr.msk.bf16.vlgmr.msra.gmra.mrb[16].mxu1 %vm504_vm1, %v1021_v57 }
 0x501   : > { %1542 = vmatprep.mubr.msk.bf16.mxu1 %vm1613_vm0, %v1612_v1  ;;  %1535 = vmatpush3.bf16.msra.mxu1 %v1576_v21 }
 0x502   : > { %1536 = vmatprep.subr.bf16.mxu1 %v1612_v1 }
 0x505   : > { %1537 = vmatpush3.bf16.msra.mxu1 %v1577_v22 }
 0x506   : > { %1538 = vmatprep.subr.bf16.mxu1 %v1612_v1 }
 0x509   : > { %1539 = vmatpush3.bf16.msra.mxu1 %v1578_v23 }
 0x50a   : > { %1540 = vmatprep.subr.bf16.mxu1 %v1612_v1 }
 0x50d   : > { %1541 = vmatpush3.bf16.msra.mxu1 %v1579_v24 }
 0x5d3   : > { %v1082_v60 = vpop.f32.mrb[16].mxu1 }
 0x5d4   : > { %v1083_v61 = vadd.f32 %v1412_v58, %v1082_v60  ;;  %v1524_v62 = vpop.f32.mrb[17].mxu1 }
 0x5d5   : > { %v1085_v63 = vpop.f32.mrb[18].mxu1 }
 0x5d6   : > { %v1525_v0 = vpop.f32.mrb[19].mxu1  ;;  %v1088_v2 = vadd.f32 %v1083_v61, %v479_v59 }
 0x5d8   : > { %v1091_v4 = vsel %vm504_vm1, %v1088_v2, 0.0 }
 0x5d9   : > { %1092 = vadd.xlane.f32.xlu0 %v1091_v4 }
 0x666   : > { %v1093_v5 = vpop.xlane.xlu0 %1092 }
 0x667   : > { %v1095_v6 = vmul.f32 0.03125, %v1093_v5 }
 0x669   : > { %v1096_v7 = vsub.f32 %v1088_v2, %v1095_v6 }
 0x66b   : > { %v1097_v8 = vmul.f32 %v1096_v7, %v1096_v7 }
 0x66d   : > { %v1098_v10 = vsel %vm504_vm1, %v1097_v8, 0.0 }
 0x66e   : > { %1099 = vadd.xlane.f32.xlu1 %v1098_v10 }
 0x6fb   : > { %v1100_v12 = vpop.xlane.xlu1 %1099 }
 0x6fc   : > { %v1101_v13 = vmul.f32 0.03125, %v1100_v12 }
 0x6fe   : > { %v1102_v14 = vadd.f32 1e-12, %v1101_v13  ;;  %v1429_v13 = vld [vmem:[%s1890_s13] ss:$0 sm:$0xff] }
 0x700   : > { %1596 = vrsqrt.f32 %v1102_v14 }
 0x70a   : > { %v1597_v15 = vpop.eup %1596 }
 0x70b   : > { %v1104_v17 = vmul.f32 %v1597_v15, %v1096_v7 }
 0x70d   : > { %v1111_v19 = vmul.f32 %v1416_v16, %v1104_v17 }
 0x70f   : > { %v1118_v20 = vadd.f32 %v1417_v18, %v1111_v19 }
 0x711   : > { %v1119_v9 = vpack.c.bf16 %v1118_v20, %v1118_v20 }
 0x713   : > { %1531 = vmatmul.mubr.msk.bf16.vlgmr.msra.gmra.mrb[20].mxu0 %vm504_vm1, %v1119_v9 }
 0x7e6   : > { %v1180_v26 = vpop.f32.mrb[20].mxu0 }
 0x7e7   : > { %v1181_v27 = vadd.f32 %v1418_v25, %v1180_v26  ;;  %v1532_v28 = vpop.f32.mrb[21].mxu0 }
 0x7e8   : > { %v1183_v29 = vpop.f32.mrb[22].mxu0 }
 0x7e9   : > { %v1187_v30 = vmul.f32 0.70710677, %v1181_v27  ;;  %v1533_v31 = vpop.f32.mrb[23].mxu0  ;;  %v1186_v52 = vmul.f32 0.5, %v1181_v27 }
 0x7eb   : > { %v1188_v32 = vand.u32 2147483647, %v1187_v30  ;;  %vm1208_vm6 = vcmp.ge.f32.partialorder %v1187_v30, 0.0 }
 0x7ed   : > { %v1189_v33 = vmul.f32 0.3275911, %v1188_v32  ;;  %v1202_v1 = vsub.f32 0.0, %v1188_v32 }
 0x7ef   : > { %v1190_v34 = vadd.f32 1.0, %v1189_v33  ;;  %v1203_v36 = vmul.f32 %v1202_v1, %v1188_v32 }
 0x7f1   : > { %1598 = vrcp.f32 %v1190_v34  ;;  %v1204_v39 = vmul.f32 1.442695, %v1203_v36 }
 0x7f3   : > { %1600 = vpow2.f32 %v1204_v39 }
 0x7fb   : > { %v1599_v35 = vpop.eup %1598 }
 0x7fc   : > { %v1193_v37 = vmul.f32 1.0614054, %v1599_v35 }
 0x7fd   : > { %v1601_v47 = vpop.eup %1600 }
 0x7fe   : > { %v1194_v38 = vadd.f32 -1.4531521, %v1193_v37 }
 0x800   : > { %v1195_v40 = vmul.f32 %v1599_v35, %v1194_v38 }
 0x802   : > { %v1196_v41 = vadd.f32 1.4214138, %v1195_v40 }
 0x804   : > { %v1197_v42 = vmul.f32 %v1599_v35, %v1196_v41 }
 0x806   : > { %v1198_v43 = vadd.f32 -0.28449672, %v1197_v42 }
 0x808   : > { %v1199_v44 = vmul.f32 %v1599_v35, %v1198_v43 }
 0x80a   : > { %v1200_v45 = vadd.f32 0.2548296, %v1199_v44 }
 0x80c   : > { %v1201_v46 = vmul.f32 %v1599_v35, %v1200_v45 }
 0x80e   : > { %v1206_v48 = vmul.f32 %v1601_v47, %v1201_v46 }
 0x810   : > { %v1207_v49 = vsub.f32 1.0, %v1206_v48 }
 0x812   : > { %v1209_v50 = vsub.f32 0.0, %v1207_v49 }
 0x814   : > { %v1210_v51 = vsel %vm1208_vm6, %v1207_v49, %v1209_v50 }
 0x815   : > { %v1211_v53 = vadd.f32 1.0, %v1210_v51 }
 0x817   : > { %v1212_v54 = vmul.f32 %v1211_v53, %v1186_v52 }
 0x819   : > { %v1213_v55 = vpack.c.bf16 %v1212_v54, %v1212_v54 }
 0x81b   : > { %1543 = vmatmul.mubr.msk.bf16.vlgmr.msra.gmra.mrb[20].mxu1 %vm1253_vm7, %v1213_v55 }
 0x8ee   : > { %v1291_v57 = vpop.f32.mrb[20].mxu1 }
 0x8ef   : > { %v1292_v58 = vadd.f32 %v1422_v56, %v1291_v57  ;;  %v1544_v59 = vpop.f32.mrb[21].mxu1 }
 0x8f0   : > { %v1294_v60 = vpop.f32.mrb[22].mxu1 }
 0x8f1   : > { %v1545_v61 = vpop.f32.mrb[23].mxu1  ;;  %v1297_v62 = vadd.f32 %v1292_v58, %v1118_v20 }
 0x8f3   : > { %v1300_v63 = vsel %vm504_vm1, %v1297_v62, 0.0 }
 0x8f4   : > { %1301 = vadd.xlane.f32.xlu0 %v1300_v63 }
 0x981   : > { %v1302_v0 = vpop.xlane.xlu0 %1301 }
 0x982   : > { %v1303_v2 = vmul.f32 0.03125, %v1302_v0 }
 0x984   : > { %v1304_v4 = vsub.f32 %v1297_v62, %v1303_v2 }
 0x986   : > { %v1305_v5 = vmul.f32 %v1304_v4, %v1304_v4 }
 0x988   : > { %v1306_v6 = vsel %vm504_vm1, %v1305_v5, 0.0 }
 0x989   : > { %1307 = vadd.xlane.f32.xlu0 %v1306_v6 }
 0xa16   : > { %v1308_v7 = vpop.xlane.xlu0 %1307 }
 0xa17   : > { %v1309_v8 = vmul.f32 0.03125, %v1308_v7 }
 0xa19   : > { %v1310_v10 = vadd.f32 1e-12, %v1309_v8 }
 0xa1b   : > { %1602 = vrsqrt.f32 %v1310_v10 }
 0xa25   : > { %v1603_v3 = vpop.eup %1602 }
 0xa26   : > { %v1312_v12 = vmul.f32 %v1603_v3, %v1304_v4 }
 0xa28   : > { %v1319_v14 = vmul.f32 %v1428_v11, %v1312_v12 }
 0xa2a   : > { %v1326_v15 = vadd.f32 %v1429_v13, %v1319_v14 }
 0xa2c   : > { %v1327_v16 = vpack.c.bf16 %v1326_v15, %v1326_v15 }
 0xa2e   : > { %1329 = vst.msk [vmem:[%s476_s22] sm:$0xf] %vm1328_vm8, %v1327_v16 }
 0xa2f PF: > { %s24_s29 = sadd.s32 1, %s1610_s29  }
 0xa30   : > { %p21_p4 = scmp.ge.s32.totalorder %s24_s29, 4  }
 0xa32   :  { %23 = sbr.rel (!%p21_p4) target bundleno = 1 (0x1), region = 109 }

</bundles_post_ra>
